<compile_context>
chip_gen: v5e
topology: v5e:2x2
jax: 0.10.0
libtpu: 0.0.40
codegen_flags: <defaults>
</compile_context>

<pallas_src>
import math
import jax
import jax.numpy as jnp
from jax import lax
from jax.experimental import pallas as pl
from jax.experimental.pallas import tpu as pltpu

NEG_INF = -1e30
LANE = 128


def _ceil_to(x, m):
    return ((x + m - 1) // m) * m


def _masked_softmax(logits, mask):
    ml = mask * logits + (1.0 - mask) * NEG_INF
    m = jnp.max(ml, axis=-1, keepdims=True)
    e = jnp.exp(ml - m)
    return e / jnp.sum(e, axis=-1, keepdims=True)


def _masked_log_softmax(logits, mask):
    ml = mask * logits + (1.0 - mask) * NEG_INF
    m = jnp.max(ml, axis=-1, keepdims=True)
    shifted = ml - m
    return shifted - jnp.log(jnp.sum(jnp.exp(shifted), axis=-1, keepdims=True))


def bidaf_output_kernel(q_ref, qmask_ref, mod_ref, mask_ref,
                        w_qa_ref, ia_ref, w_p_ref, w_ms_ref, w_ls_ref,
                        w_rnn_ref, b_rnn_ref,
                        log_p1_ref, log_p2_ref):
    """One batch element per grid step. Activations are (D, L) column-major so
    all sequence dims sit on lanes and every reduction is an MXU matmul."""
    f32 = jnp.float32

    q_t = q_ref[0]           # (Dp, Lqp)   q[b].T  (zero-padded)
    mod_t = mod_ref[0]       # (Dp, Lcp)   mod[b].T
    q_mask = qmask_ref[0]    # (1, Lqp)
    mask = mask_ref[0]       # (1, Lcp)

    W_qa = w_qa_ref[...]     # (Hp, Dp)    question_attn.weight
    ia = ia_ref[...]         # (Hp, 1)     init_attn(attnInit).T  (host-folded)
    w_p = w_p_ref[...]       # (1, Hp)     attn_proj.weight
    W_ms = w_ms_ref[...]     # (Hp, Dp)    modState.weight
    W_ls = w_ls_ref[...]     # (Hp, Dp)    lastState.weight
    W_rnn = w_rnn_ref[...]   # (Dp, 2*Dp)  [W_ih | W_hh]  (ansPoint)
    b_rnn = b_rnn_ref[...]   # (Dp, 1)     b_ih + b_hh

    # --- question attention -> init state column (Dp, 1) --------------------
    qa = jnp.dot(W_qa, q_t, preferred_element_type=f32)                 # (Hp, Lqp)
    quest_att = jnp.dot(w_p, jnp.tanh(qa + ia),
                        preferred_element_type=f32)                     # (1, Lqp)
    nu = _masked_softmax(quest_att, q_mask)                             # (1, Lqp)
    init = lax.dot_general(q_t, nu, (((1,), (1,)), ((), ())),
                           preferred_element_type=f32)                  # (Dp, 1)

    # --- start-pointer logits (lane-dense row) -------------------------------
    ms = jnp.dot(W_ms, mod_t, preferred_element_type=f32)               # (Hp, Lcp)
    ls_init = jnp.dot(W_ls, init, preferred_element_type=f32)           # (Hp, 1)
    logits_1 = jnp.dot(w_p, jnp.tanh(ms + ls_init),
                       preferred_element_type=f32)                      # (1, Lcp)

    log_p1 = _masked_log_softmax(logits_1, mask)
    b1 = jnp.exp(log_p1)                       # softmax from log-softmax (1 pass)
    wb1 = lax.dot_general(mod_t, b1, (((1,), (1,)), ((), ())),
                          preferred_element_type=f32)                   # (Dp, 1)

    # --- ansPoint: one fused vanilla tanh-RNN step, h0 = init ---------------
    # (F.dropout on `new` is identity in eval mode.)
    xh = jnp.concatenate([wb1, init], axis=0)                           # (2*Dp, 1)
    new = jnp.tanh(jnp.dot(W_rnn, xh, preferred_element_type=f32) + b_rnn)

    # --- end-pointer logits ---------------------------------------------------
    ls_new = jnp.dot(W_ls, new, preferred_element_type=f32)             # (Hp, 1)
    logits_2 = jnp.dot(w_p, jnp.tanh(ms + ls_new),
                       preferred_element_type=f32)                      # (1, Lcp)

    log_p1_ref[0] = log_p1
    log_p2_ref[0] = _masked_log_softmax(logits_2, mask)


def bidaf_output_rnn_multi(att, q, q_mask, mod, mask, params):
    # `att` ((B, Lc, 8H)) is accepted for signature parity with the PyTorch
    # module but is unused by its forward pass.
    del att
    B, Lq, D = q.shape
    Lc = mod.shape[1]
    H = params["W_question_attn"].shape[0]

    Hp = _ceil_to(H, LANE)
    Dp = _ceil_to(D, LANE)
    Lqp = _ceil_to(Lq, LANE)
    Lcp = _ceil_to(Lc, LANE)

    def pad2(x, r, c):
        return jnp.pad(x, ((0, r - x.shape[0]), (0, c - x.shape[1])))

    # Activations: transpose so the sequence length is the lane dim, zero-pad.
    q_t = jnp.pad(jnp.swapaxes(q, 1, 2), ((0, 0), (0, Dp - D), (0, Lqp - Lq)))
    mod_t = jnp.pad(jnp.swapaxes(mod, 1, 2), ((0, 0), (0, Dp - D), (0, Lcp - Lc)))
    q_mask_p = jnp.pad(q_mask, ((0, 0), (0, Lqp - Lq)))[:, None, :]
    mask_p = jnp.pad(mask, ((0, 0), (0, Lcp - Lc)))[:, None, :]

    # Host-side parameter prep: padding, constant folding, RNN weight fusion.
    W_qa = pad2(params["W_question_attn"], Hp, Dp)
    ia = pad2((params["attnInit"] @ params["W_init_attn"].T).T, Hp, 1)   # (Hp, 1)
    w_p = pad2(params["W_attn_proj"], 1, Hp)                             # (1, Hp)
    W_ms = pad2(params["W_modState"], Hp, Dp)
    W_ls = pad2(params["W_lastState"], Hp, Dp)
    W_rnn = jnp.concatenate([pad2(params["W_ih"], Dp, Dp),
                             pad2(params["W_hh"], Dp, Dp)], axis=1)      # (Dp, 2Dp)
    b_rnn = pad2((params["b_ih"] + params["b_hh"]).T, Dp, 1)             # (Dp, 1)

    def per_batch(shape):
        return pl.BlockSpec(shape, lambda b: (b, 0, 0))

    def full2d(shape):
        return pl.BlockSpec(shape, lambda b: (0, 0))

    # Advisory cost estimate (f32 everywhere).
    flops = 2 * B * (Hp * Dp * (Lqp + Lcp)          # qa, ms
                     + Hp * (Lqp + 2 * Lcp)         # attn_proj matvecs
                     + Dp * (Lqp + Lcp)             # init, weighted_b1
                     + 2 * Dp * Dp                  # fused RNN step
                     + 2 * Hp * Dp)                 # lastState(init/new)
    transcendentals = B * (Hp * (Lqp + 2 * Lcp) + Dp + 3 * (Lqp + Lcp))
    bytes_accessed = 4 * (q_t.size + mod_t.size + q_mask_p.size + mask_p.size
                          + W_qa.size + ia.size + w_p.size + W_ms.size
                          + W_ls.size + W_rnn.size + b_rnn.size + 2 * B * Lcp)

    log_p1_p, log_p2_p = pl.pallas_call(
        bidaf_output_kernel,
        out_shape=(jax.ShapeDtypeStruct((B, 1, Lcp), jnp.float32),
                   jax.ShapeDtypeStruct((B, 1, Lcp), jnp.float32)),
        grid_spec=pltpu.PrefetchScalarGridSpec(
            num_scalar_prefetch=0,
            grid=(B,),
            in_specs=[
                per_batch((1, Dp, Lqp)),     # q_t
                per_batch((1, 1, Lqp)),      # q_mask
                per_batch((1, Dp, Lcp)),     # mod_t
                per_batch((1, 1, Lcp)),      # mask
                full2d((Hp, Dp)),            # W_question_attn
                full2d((Hp, 1)),             # init_attn(attnInit)
                full2d((1, Hp)),             # attn_proj
                full2d((Hp, Dp)),            # modState
                full2d((Hp, Dp)),            # lastState
                full2d((Dp, 2 * Dp)),        # [W_ih | W_hh]
                full2d((Dp, 1)),             # b_ih + b_hh
            ],
            out_specs=(per_batch((1, 1, Lcp)), per_batch((1, 1, Lcp))),
        ),
        compiler_params=pltpu.CompilerParams(
            dimension_semantics=("parallel",),
            vmem_limit_bytes=32 * 1024 * 1024),
        cost_estimate=pl.CostEstimate(flops=flops,
                                      transcendentals=transcendentals,
                                      bytes_accessed=bytes_accessed),
    )(q_t, q_mask_p, mod_t, mask_p, W_qa, ia, w_p, W_ms, W_ls, W_rnn, b_rnn)

    return log_p1_p[:, 0, :Lc], log_p2_p[:, 0, :Lc]


def reference(q, q_mask, mod, mask, p):
    """Pure-JAX reference mirroring the PyTorch forward (eval mode)."""
    w_p = p["W_attn_proj"][0]                                         # (H,)
    qa = jnp.einsum("bld,hd->blh", q, p["W_question_attn"])
    ia = p["attnInit"] @ p["W_init_attn"].T                           # (1, H)
    quest_att = jnp.einsum("blh,h->bl", jnp.tanh(qa + ia[None]), w_p)
    nu = _masked_softmax(quest_att, q_mask)
    init = jnp.einsum("bl,bld->bd", nu, q)
    ms = jnp.einsum("bld,hd->blh", mod, p["W_modState"])
    ls_i = init @ p["W_lastState"].T
    logits_1 = jnp.einsum("blh,h->bl", jnp.tanh(ms + ls_i[:, None, :]), w_p)
    b1 = _masked_softmax(logits_1, mask)
    wb1 = jnp.einsum("bl,bld->bd", b1, mod)
    new = jnp.tanh(wb1 @ p["W_ih"].T + p["b_ih"] + init @ p["W_hh"].T + p["b_hh"])
    ls_n = new @ p["W_lastState"].T
    logits_2 = jnp.einsum("blh,h->bl", jnp.tanh(ms + ls_n[:, None, :]), w_p)
    return _masked_log_softmax(logits_1, mask), _masked_log_softmax(logits_2, mask)


if __name__ == "__main__":
    B, H, Lq, Lc = 2, 32, 8, 16
    D = 2 * H

    key = jax.random.PRNGKey(0)
    keys = jax.random.split(key, 16)

    att = jax.random.normal(keys[0], (B, Lc, 8 * H), jnp.float32)  # unused by forward
    q = jax.random.normal(keys[1], (B, Lq, D), jnp.float32)
    mod = jax.random.normal(keys[2], (B, Lc, D), jnp.float32)

    q_lens = jnp.array([Lq, Lq - 2])
    c_lens = jnp.array([Lc, Lc - 4])
    q_mask = (jnp.arange(Lq)[None, :] < q_lens[:, None]).astype(jnp.float32)
    mask = (jnp.arange(Lc)[None, :] < c_lens[:, None]).astype(jnp.float32)

    def lin(k, out_f, in_f):
        b = 1.0 / math.sqrt(in_f)
        return jax.random.uniform(k, (out_f, in_f), jnp.float32, -b, b)

    xb = math.sqrt(6.0 / (1 + D))      # xavier_uniform bound for attnInit
    rb = 1.0 / math.sqrt(D)            # nn.RNN default init bound

    params = {
        "W_question_attn": lin(keys[3], H, D),
        "W_init_attn": lin(keys[4], H, D),
        "attnInit": jax.random.uniform(keys[5], (1, D), jnp.float32, -xb, xb),
        "W_attn_proj": lin(keys[6], 1, H),
        "W_modState": lin(keys[7], H, D),
        "W_lastState": lin(keys[8], H, D),
        "W_ih": jax.random.uniform(keys[9], (D, D), jnp.float32, -rb, rb),
        "W_hh": jax.random.uniform(keys[10], (D, D), jnp.float32, -rb, rb),
        "b_ih": jax.random.uniform(keys[11], (1, D), jnp.float32, -rb, rb),
        "b_hh": jax.random.uniform(keys[12], (1, D), jnp.float32, -rb, rb),
    }

    log_p1, log_p2 = bidaf_output_rnn_multi(att, q, q_mask, mod, mask, params)
    jax.block_until_ready((log_p1, log_p2))

    ref_p1, ref_p2 = reference(q, q_mask, mod, mask, params)
    assert log_p1.shape == (B, Lc) and log_p2.shape == (B, Lc)
    assert jnp.allclose(log_p1, ref_p1, atol=1e-3, rtol=1e-4)
    assert jnp.allclose(log_p2, ref_p2, atol=1e-3, rtol=1e-4)

    print("KERNEL_OK")
</pallas_src>

<mosaic_0001>
module attributes {stable_mosaic.version = 11 : i64} {
  func.func @bidaf_output_kernel(%arg0: i32, %arg1: memref<1x128x128xf32, #tpu.memory_space<vmem>>, %arg2: memref<1x1x128xf32, #tpu.memory_space<vmem>>, %arg3: memref<1x128x128xf32, #tpu.memory_space<vmem>>, %arg4: memref<1x1x128xf32, #tpu.memory_space<vmem>>, %arg5: memref<128x128xf32, #tpu.memory_space<vmem>>, %arg6: memref<128x1xf32, #tpu.memory_space<vmem>>, %arg7: memref<1x128xf32, #tpu.memory_space<vmem>>, %arg8: memref<128x128xf32, #tpu.memory_space<vmem>>, %arg9: memref<128x128xf32, #tpu.memory_space<vmem>>, %arg10: memref<128x256xf32, #tpu.memory_space<vmem>>, %arg11: memref<128x1xf32, #tpu.memory_space<vmem>>, %arg12: memref<1x1x128xf32, #tpu.memory_space<vmem>>, %arg13: memref<1x1x128xf32, #tpu.memory_space<vmem>>) attributes {dimension_semantics = [#tpu.dimension_semantics<parallel>], iteration_bounds = array<i64: 2>, scalar_prefetch = 0 : i64, scratch_operands = 0 : i64, tpu.core_type = #tpu.core_type<tc>, window_params = [{transform_indices = @transform_0, window_bounds = array<i64: 1, 128, 128>}, {transform_indices = @transform_1, window_bounds = array<i64: 1, 1, 128>}, {transform_indices = @transform_2, window_bounds = array<i64: 1, 128, 128>}, {transform_indices = @transform_3, window_bounds = array<i64: 1, 1, 128>}, {pipeline_mode = #tpu.pipeline_mode<synchronous>, transform_indices = @transform_4, window_bounds = array<i64: 128, 128>}, {pipeline_mode = #tpu.pipeline_mode<synchronous>, transform_indices = @transform_5, window_bounds = array<i64: 128, 1>}, {pipeline_mode = #tpu.pipeline_mode<synchronous>, transform_indices = @transform_6, window_bounds = array<i64: 1, 128>}, {pipeline_mode = #tpu.pipeline_mode<synchronous>, transform_indices = @transform_7, window_bounds = array<i64: 128, 128>}, {pipeline_mode = #tpu.pipeline_mode<synchronous>, transform_indices = @transform_8, window_bounds = array<i64: 128, 128>}, {pipeline_mode = #tpu.pipeline_mode<synchronous>, transform_indices = @transform_9, window_bounds = array<i64: 128, 256>}, {pipeline_mode = #tpu.pipeline_mode<synchronous>, transform_indices = @transform_10, window_bounds = array<i64: 128, 1>}, {transform_indices = @transform_11, window_bounds = array<i64: 1, 1, 128>}, {transform_indices = @transform_12, window_bounds = array<i64: 1, 1, 128>}]} {
    %c0 = arith.constant 0 : index
    %c0_0 = arith.constant 0 : index
    %c0_1 = arith.constant 0 : index
    %0 = vector.load %arg1[%c0, %c0_0, %c0_1] : memref<1x128x128xf32, #tpu.memory_space<vmem>>, vector<1x128x128xf32>
    %1 = vector.shape_cast %0 : vector<1x128x128xf32> to vector<128x128xf32>
    %c0_2 = arith.constant 0 : index
    %c0_3 = arith.constant 0 : index
    %c0_4 = arith.constant 0 : index
    %2 = vector.load %arg3[%c0_2, %c0_3, %c0_4] : memref<1x128x128xf32, #tpu.memory_space<vmem>>, vector<1x128x128xf32>
    %3 = vector.shape_cast %2 : vector<1x128x128xf32> to vector<128x128xf32>
    %c0_5 = arith.constant 0 : index
    %c0_6 = arith.constant 0 : index
    %c0_7 = arith.constant 0 : index
    %4 = vector.load %arg2[%c0_5, %c0_6, %c0_7] : memref<1x1x128xf32, #tpu.memory_space<vmem>>, vector<1x1x128xf32>
    %5 = vector.shape_cast %4 : vector<1x1x128xf32> to vector<1x128xf32>
    %c0_8 = arith.constant 0 : index
    %c0_9 = arith.constant 0 : index
    %c0_10 = arith.constant 0 : index
    %6 = vector.load %arg4[%c0_8, %c0_9, %c0_10] : memref<1x1x128xf32, #tpu.memory_space<vmem>>, vector<1x1x128xf32>
    %7 = vector.shape_cast %6 : vector<1x1x128xf32> to vector<1x128xf32>
    %c0_11 = arith.constant 0 : index
    %c0_12 = arith.constant 0 : index
    %8 = vector.load %arg5[%c0_11, %c0_12] : memref<128x128xf32, #tpu.memory_space<vmem>>, vector<128x128xf32>
    %c0_13 = arith.constant 0 : index
    %c0_14 = arith.constant 0 : index
    %9 = vector.load %arg6[%c0_13, %c0_14] : memref<128x1xf32, #tpu.memory_space<vmem>>, vector<128x1xf32>
    %c0_15 = arith.constant 0 : index
    %c0_16 = arith.constant 0 : index
    %10 = vector.load %arg7[%c0_15, %c0_16] : memref<1x128xf32, #tpu.memory_space<vmem>>, vector<1x128xf32>
    %c0_17 = arith.constant 0 : index
    %c0_18 = arith.constant 0 : index
    %11 = vector.load %arg8[%c0_17, %c0_18] : memref<128x128xf32, #tpu.memory_space<vmem>>, vector<128x128xf32>
    %c0_19 = arith.constant 0 : index
    %c0_20 = arith.constant 0 : index
    %12 = vector.load %arg9[%c0_19, %c0_20] : memref<128x128xf32, #tpu.memory_space<vmem>>, vector<128x128xf32>
    %c0_21 = arith.constant 0 : index
    %c0_22 = arith.constant 0 : index
    %13 = vector.load %arg10[%c0_21, %c0_22] : memref<128x256xf32, #tpu.memory_space<vmem>>, vector<128x256xf32>
    %c0_23 = arith.constant 0 : index
    %c0_24 = arith.constant 0 : index
    %14 = vector.load %arg11[%c0_23, %c0_24] : memref<128x1xf32, #tpu.memory_space<vmem>>, vector<128x1xf32>
    %cst = arith.constant dense<0.000000e+00> : vector<128x128xf32>
    %15 = tpu.matmul %8, %1, %cst {dimension_numbers = #tpu.dot_dimension_numbers<[1], [0], [0], [1], [0, 0, 1, 1], [], []>} : vector<128x128xf32>, vector<128x128xf32>, vector<128x128xf32> -> vector<128x128xf32>
    %16 = vector.broadcast %9 : vector<128x1xf32> to vector<128x128xf32>
    %17 = arith.addf %15, %16 : vector<128x128xf32>
    %18 = math.tanh %17 : vector<128x128xf32>
    %cst_25 = arith.constant dense<0.000000e+00> : vector<1x128xf32>
    %19 = tpu.matmul %10, %18, %cst_25 {dimension_numbers = #tpu.dot_dimension_numbers<[1], [0], [0], [1], [0, 0, 1, 1], [], []>} : vector<1x128xf32>, vector<128x128xf32>, vector<1x128xf32> -> vector<1x128xf32>
    %20 = arith.mulf %5, %19 : vector<1x128xf32>
    %cst_26 = arith.constant 1.000000e+00 : f32
    %21 = vector.broadcast %cst_26 : f32 to vector<1x128xf32>
    %22 = arith.subf %21, %5 : vector<1x128xf32>
    %cst_27 = arith.constant -1.000000e+30 : f32
    %23 = vector.broadcast %cst_27 : f32 to vector<1x128xf32>
    %24 = arith.mulf %22, %23 : vector<1x128xf32>
    %25 = arith.addf %20, %24 : vector<1x128xf32>
    %cst_28 = arith.constant dense<0xFF800000> : vector<1xf32>
    %26 = vector.multi_reduction <maximumf>, %25, %cst_28 [1] : vector<1x128xf32> to vector<1xf32>
    %27 = vector.shape_cast %26 : vector<1xf32> to vector<1x1xf32>
    %28 = vector.broadcast %27 : vector<1x1xf32> to vector<1x128xf32>
    %29 = arith.subf %25, %28 : vector<1x128xf32>
    %30 = math.exp %29 : vector<1x128xf32>
    %cst_29 = arith.constant dense<0.000000e+00> : vector<1xf32>
    %31 = vector.multi_reduction <add>, %30, %cst_29 [1] : vector<1x128xf32> to vector<1xf32>
    %32 = vector.shape_cast %31 : vector<1xf32> to vector<1x1xf32>
    %33 = vector.broadcast %32 : vector<1x1xf32> to vector<1x128xf32>
    %34 = arith.divf %30, %33 : vector<1x128xf32>
    %cst_30 = arith.constant dense<0.000000e+00> : vector<128x1xf32>
    %35 = tpu.matmul %1, %34, %cst_30 {dimension_numbers = #tpu.dot_dimension_numbers<[1], [1], [0], [0], [0, 0, 1, 0], [], []>} : vector<128x128xf32>, vector<1x128xf32>, vector<128x1xf32> -> vector<128x1xf32>
    %cst_31 = arith.constant dense<0.000000e+00> : vector<128x128xf32>
    %36 = tpu.matmul %11, %3, %cst_31 {dimension_numbers = #tpu.dot_dimension_numbers<[1], [0], [0], [1], [0, 0, 1, 1], [], []>} : vector<128x128xf32>, vector<128x128xf32>, vector<128x128xf32> -> vector<128x128xf32>
    %cst_32 = arith.constant dense<0.000000e+00> : vector<128x1xf32>
    %37 = tpu.matmul %12, %35, %cst_32 {dimension_numbers = #tpu.dot_dimension_numbers<[1], [0], [0], [1], [0, 0, 1, 1], [], []>} : vector<128x128xf32>, vector<128x1xf32>, vector<128x1xf32> -> vector<128x1xf32>
    %38 = vector.broadcast %37 : vector<128x1xf32> to vector<128x128xf32>
    %39 = arith.addf %36, %38 : vector<128x128xf32>
    %40 = math.tanh %39 : vector<128x128xf32>
    %cst_33 = arith.constant dense<0.000000e+00> : vector<1x128xf32>
    %41 = tpu.matmul %10, %40, %cst_33 {dimension_numbers = #tpu.dot_dimension_numbers<[1], [0], [0], [1], [0, 0, 1, 1], [], []>} : vector<1x128xf32>, vector<128x128xf32>, vector<1x128xf32> -> vector<1x128xf32>
    %42 = arith.mulf %7, %41 : vector<1x128xf32>
    %cst_34 = arith.constant 1.000000e+00 : f32
    %43 = vector.broadcast %cst_34 : f32 to vector<1x128xf32>
    %44 = arith.subf %43, %7 : vector<1x128xf32>
    %cst_35 = arith.constant -1.000000e+30 : f32
    %45 = vector.broadcast %cst_35 : f32 to vector<1x128xf32>
    %46 = arith.mulf %44, %45 : vector<1x128xf32>
    %47 = arith.addf %42, %46 : vector<1x128xf32>
    %cst_36 = arith.constant dense<0xFF800000> : vector<1xf32>
    %48 = vector.multi_reduction <maximumf>, %47, %cst_36 [1] : vector<1x128xf32> to vector<1xf32>
    %49 = vector.shape_cast %48 : vector<1xf32> to vector<1x1xf32>
    %50 = vector.broadcast %49 : vector<1x1xf32> to vector<1x128xf32>
    %51 = arith.subf %47, %50 : vector<1x128xf32>
    %52 = math.exp %51 : vector<1x128xf32>
    %cst_37 = arith.constant dense<0.000000e+00> : vector<1xf32>
    %53 = vector.multi_reduction <add>, %52, %cst_37 [1] : vector<1x128xf32> to vector<1xf32>
    %54 = vector.shape_cast %53 : vector<1xf32> to vector<1x1xf32>
    %55 = math.log %54 : vector<1x1xf32>
    %56 = vector.broadcast %55 : vector<1x1xf32> to vector<1x128xf32>
    %57 = arith.subf %51, %56 : vector<1x128xf32>
    %58 = math.exp %57 : vector<1x128xf32>
    %cst_38 = arith.constant dense<0.000000e+00> : vector<128x1xf32>
    %59 = tpu.matmul %3, %58, %cst_38 {dimension_numbers = #tpu.dot_dimension_numbers<[1], [1], [0], [0], [0, 0, 1, 0], [], []>} : vector<128x128xf32>, vector<1x128xf32>, vector<128x1xf32> -> vector<128x1xf32>
    %60 = tpu.concatenate %59, %35 in 0 : vector<128x1xf32>, vector<128x1xf32> -> vector<256x1xf32>
    %cst_39 = arith.constant dense<0.000000e+00> : vector<128x1xf32>
    %61 = tpu.matmul %13, %60, %cst_39 {dimension_numbers = #tpu.dot_dimension_numbers<[1], [0], [0], [1], [0, 0, 1, 1], [], []>} : vector<128x256xf32>, vector<256x1xf32>, vector<128x1xf32> -> vector<128x1xf32>
    %62 = arith.addf %61, %14 : vector<128x1xf32>
    %63 = math.tanh %62 : vector<128x1xf32>
    %cst_40 = arith.constant dense<0.000000e+00> : vector<128x1xf32>
    %64 = tpu.matmul %12, %63, %cst_40 {dimension_numbers = #tpu.dot_dimension_numbers<[1], [0], [0], [1], [0, 0, 1, 1], [], []>} : vector<128x128xf32>, vector<128x1xf32>, vector<128x1xf32> -> vector<128x1xf32>
    %65 = vector.broadcast %64 : vector<128x1xf32> to vector<128x128xf32>
    %66 = arith.addf %36, %65 : vector<128x128xf32>
    %67 = math.tanh %66 : vector<128x128xf32>
    %cst_41 = arith.constant dense<0.000000e+00> : vector<1x128xf32>
    %68 = tpu.matmul %10, %67, %cst_41 {dimension_numbers = #tpu.dot_dimension_numbers<[1], [0], [0], [1], [0, 0, 1, 1], [], []>} : vector<1x128xf32>, vector<128x128xf32>, vector<1x128xf32> -> vector<1x128xf32>
    %c0_42 = arith.constant 0 : index
    %c0_43 = arith.constant 0 : index
    %c0_44 = arith.constant 0 : index
    %69 = vector.load %arg12[%c0_42, %c0_43, %c0_44] : memref<1x1x128xf32, #tpu.memory_space<vmem>>, vector<1x1x128xf32>
    %70 = vector.shape_cast %69 : vector<1x1x128xf32> to vector<1x128xf32>
    %71 = vector.shape_cast %57 : vector<1x128xf32> to vector<1x1x128xf32>
    tpu.vector_store %arg12[%c0_42, %c0_43, %c0_44], %71 {strides = array<i32>} : memref<1x1x128xf32, #tpu.memory_space<vmem>>, vector<1x1x128xf32>,
    %72 = arith.mulf %7, %68 : vector<1x128xf32>
    %cst_45 = arith.constant 1.000000e+00 : f32
    %73 = vector.broadcast %cst_45 : f32 to vector<1x128xf32>
    %74 = arith.subf %73, %7 : vector<1x128xf32>
    %cst_46 = arith.constant -1.000000e+30 : f32
    %75 = vector.broadcast %cst_46 : f32 to vector<1x128xf32>
    %76 = arith.mulf %74, %75 : vector<1x128xf32>
    %77 = arith.addf %72, %76 : vector<1x128xf32>
    %cst_47 = arith.constant dense<0xFF800000> : vector<1xf32>
    %78 = vector.multi_reduction <maximumf>, %77, %cst_47 [1] : vector<1x128xf32> to vector<1xf32>
    %79 = vector.shape_cast %78 : vector<1xf32> to vector<1x1xf32>
    %80 = vector.broadcast %79 : vector<1x1xf32> to vector<1x128xf32>
    %81 = arith.subf %77, %80 : vector<1x128xf32>
    %82 = math.exp %81 : vector<1x128xf32>
    %cst_48 = arith.constant dense<0.000000e+00> : vector<1xf32>
    %83 = vector.multi_reduction <add>, %82, %cst_48 [1] : vector<1x128xf32> to vector<1xf32>
    %84 = vector.shape_cast %83 : vector<1xf32> to vector<1x1xf32>
    %85 = math.log %84 : vector<1x1xf32>
    %86 = vector.broadcast %85 : vector<1x1xf32> to vector<1x128xf32>
    %87 = arith.subf %81, %86 : vector<1x128xf32>
    %c0_49 = arith.constant 0 : index
    %c0_50 = arith.constant 0 : index
    %c0_51 = arith.constant 0 : index
    %88 = vector.load %arg13[%c0_49, %c0_50, %c0_51] : memref<1x1x128xf32, #tpu.memory_space<vmem>>, vector<1x1x128xf32>
    %89 = vector.shape_cast %88 : vector<1x1x128xf32> to vector<1x128xf32>
    %90 = vector.shape_cast %87 : vector<1x128xf32> to vector<1x1x128xf32>
    tpu.vector_store %arg13[%c0_49, %c0_50, %c0_51], %90 {strides = array<i32>} : memref<1x1x128xf32, #tpu.memory_space<vmem>>, vector<1x1x128xf32>,
    return
  }
  func.func @transform_0(%arg0: i32) -> (i32, i32, i32) {
    %c0_i32 = arith.constant 0 : i32
    %c0_i32_0 = arith.constant 0 : i32
    %c0_i32_1 = arith.constant 0 : i32
    return %arg0, %c0_i32, %c0_i32_0 : i32, i32, i32
  }
  func.func @transform_1(%arg0: i32) -> (i32, i32, i32) {
    %c0_i32 = arith.constant 0 : i32
    %c0_i32_0 = arith.constant 0 : i32
    %c0_i32_1 = arith.constant 0 : i32
    return %arg0, %c0_i32, %c0_i32_0 : i32, i32, i32
  }
  func.func @transform_2(%arg0: i32) -> (i32, i32, i32) {
    %c0_i32 = arith.constant 0 : i32
    %c0_i32_0 = arith.constant 0 : i32
    %c0_i32_1 = arith.constant 0 : i32
    return %arg0, %c0_i32, %c0_i32_0 : i32, i32, i32
  }
  func.func @transform_3(%arg0: i32) -> (i32, i32, i32) {
    %c0_i32 = arith.constant 0 : i32
    %c0_i32_0 = arith.constant 0 : i32
    %c0_i32_1 = arith.constant 0 : i32
    return %arg0, %c0_i32, %c0_i32_0 : i32, i32, i32
  }
  func.func @transform_4(%arg0: i32) -> (i32, i32) {
    %c0_i32 = arith.constant 0 : i32
    %c0_i32_0 = arith.constant 0 : i32
    %c0_i32_1 = arith.constant 0 : i32
    return %c0_i32, %c0_i32_0 : i32, i32
  }
  func.func @transform_5(%arg0: i32) -> (i32, i32) {
    %c0_i32 = arith.constant 0 : i32
    %c0_i32_0 = arith.constant 0 : i32
    %c0_i32_1 = arith.constant 0 : i32
    return %c0_i32, %c0_i32_0 : i32, i32
  }
  func.func @transform_6(%arg0: i32) -> (i32, i32) {
    %c0_i32 = arith.constant 0 : i32
    %c0_i32_0 = arith.constant 0 : i32
    %c0_i32_1 = arith.constant 0 : i32
    return %c0_i32, %c0_i32_0 : i32, i32
  }
  func.func @transform_7(%arg0: i32) -> (i32, i32) {
    %c0_i32 = arith.constant 0 : i32
    %c0_i32_0 = arith.constant 0 : i32
    %c0_i32_1 = arith.constant 0 : i32
    return %c0_i32, %c0_i32_0 : i32, i32
  }
  func.func @transform_8(%arg0: i32) -> (i32, i32) {
    %c0_i32 = arith.constant 0 : i32
    %c0_i32_0 = arith.constant 0 : i32
    %c0_i32_1 = arith.constant 0 : i32
    return %c0_i32, %c0_i32_0 : i32, i32
  }
  func.func @transform_9(%arg0: i32) -> (i32, i32) {
    %c0_i32 = arith.constant 0 : i32
    %c0_i32_0 = arith.constant 0 : i32
    %c0_i32_1 = arith.constant 0 : i32
    return %c0_i32, %c0_i32_0 : i32, i32
  }
  func.func @transform_10(%arg0: i32) -> (i32, i32) {
    %c0_i32 = arith.constant 0 : i32
    %c0_i32_0 = arith.constant 0 : i32
    %c0_i32_1 = arith.constant 0 : i32
    return %c0_i32, %c0_i32_0 : i32, i32
  }
  func.func @transform_11(%arg0: i32) -> (i32, i32, i32) {
    %c0_i32 = arith.constant 0 : i32
    %c0_i32_0 = arith.constant 0 : i32
    %c0_i32_1 = arith.constant 0 : i32
    return %arg0, %c0_i32, %c0_i32_0 : i32, i32, i32
  }
  func.func @transform_12(%arg0: i32) -> (i32, i32, i32) {
    %c0_i32 = arith.constant 0 : i32
    %c0_i32_0 = arith.constant 0 : i32
    %c0_i32_1 = arith.constant 0 : i32
    return %arg0, %c0_i32, %c0_i32_0 : i32, i32, i32
  }
}

</mosaic_0001>

<bundles_post_ra>
// kernel: tpu_custom_call.1
= control target key start
LH: loop header
LB: loop body
LE: loop exit
PB: predicated region body
PF: predicated region fallthrough
CT: control target
= control target key end

     0   :  { %s3181_s0 = inlined_call_operand.vmem [shape: f32[2,128,128], index: 0, kind: input, shape index: {}]   ;;  %s3182_s1 = inlined_call_operand.vmem [shape: f32[2,1,128], index: 1, kind: input, shape index: {}]   ;;  %s3183_s2 = inlined_call_operand.hbm [shape: f32[2,128,128], index: 2, kind: input, shape index: {}]   ;;  %s3184_s3 = inlined_call_operand.vmem [shape: f32[2,1,128], index: 3, kind: input, shape index: {}]   ;;  %s3185_s4 = inlined_call_operand.hbm [shape: f32[128,128], index: 4, kind: input, shape index: {}]   ;;  %s3186_s5 = inlined_call_operand.vmem [shape: f32[128,1], index: 5, kind: input, shape index: {}]   ;;  %s3187_s6 = inlined_call_operand.vmem [shape: f32[1,128], index: 6, kind: input, shape index: {}]   ;;  %s3188_s7 = inlined_call_operand.hbm [shape: f32[128,128], index: 7, kind: input, shape index: {}]   ;;  %s3189_s8 = inlined_call_operand.hbm [shape: f32[128,128], index: 8, kind: input, shape index: {}]   ;;  %s3190_s9 = inlined_call_operand.hbm [shape: f32[128,256], index: 9, kind: input, shape index: {}]   ;;  %s3191_s10 = inlined_call_operand.vmem [shape: f32[128,1], index: 10, kind: input, shape index: {}]   ;;  %s3192_s11 = inlined_call_operand.hbm [shape: f32[2,1,128], index: 11, kind: output, shape index: {0}]   ;;  %s3193_s12 = inlined_call_operand.hbm [shape: f32[2,1,128], index: 12, kind: output, shape index: {1}]  }
   0x1   :  { %3204 = sst [smem:[#allocation27_spill]] %s3185_s4 }
   0x2   :  { %3205 = sst [smem:[#allocation28_spill]] %s3188_s7 }
   0x3   :  { %3206 = sst [smem:[#allocation29_spill]] %s3189_s8 }
   0x4   :  { %3207 = sst [smem:[#allocation30_spill]] %s3190_s9 }
   0x5   :  { %18 = vsyncpa [#allocation3], 0 }
   0x6   :  { %20 = vsyncpa [#allocation3 + $0x1], 0 }
   0x7   :  { %21 = vsyncpa [#allocation6], 0 }
   0x8   :  { %22 = vsyncpa [#allocation9], 0 }
   0x9   :  { %23 = vsyncpa [#allocation4], 0 }
   0xa   :  { %25 = vsyncpa [#allocation4 + $0x1], 0 }
   0xb   :  { %26 = vsyncpa [#allocation13], 0 }
   0xc   :  { %28 = vsyncpa [#allocation13 + $0x1], 0  ;;  %s2476_s21 = smov 0   ;;  %s2478_s22 = smov 0  }
   0xd   :  { %s2480_s23 = smov 0   ;;  %s2482_s24 = smov 0  }
   0xe LB: > { %3208 = sst [smem:[#allocation19_spill]] %s2388_s21  ;;  %s2497_s25 = sadd.s32 4294967295, %s2400_s24   ;;  %s2400_s24 = sphi %s2482_s24, %s3240_s24   ;;  %s2396_s23 = sphi %s2480_s23, %s3239_s23   ;;  %s2392_s22 = sphi %s2478_s22, %s3238_s22   ;;  %s2388_s21 = sphi %s2476_s21, %s3237_s21  }
   0xf   : > { %s1847_s26 = sadd.s32 4294967294, %s2400_s24   ;;  %p106_p0 = scmp.ne.s32.totalorder %s2392_s22, %s2388_s21 }
  0x10   : > { %p107_p1 = scmp.eq.s32.totalorder %s2497_s25, 0  ;;  %p303_p2 = scmp.eq.s32.totalorder %s2497_s25, 1 }
  0x11   : > { %p309_p3 = scmp.eq.s32.totalorder %s1847_s26, 1  ;;  %p1848_p5 = scmp.ge.s32.totalorder %s2400_s24, 1 }
  0x12   : > { %p2506_p4 = por %p107_p1, %p106_p0  ;;  %p342_p7 = scmp.lt.s32.totalorder %s2400_s24, 3 }
  0x13   : > { %p2511_p6 = por %p309_p3, %p106_p0  ;;  %s3212_s4 = sld [smem:[#allocation27_spill]] }
  0x14   : > { %p2519_p8 = pnand %p1848_p5, %p342_p7  ;;  %s2402_s15 = smov [#allocation5]  }
  0x15   : > { %s3210_s28 = scalar_select %p2511_p6, 1, 0 }
  0x16   : > { %p1923_p9 = pneg %p2519_p8  ;;  %s355_s16 = sshll.u32 %s2402_s15, 4  ;;  %s356_s16 = int_to_ptr.vmem [resolvable:$true] %s355_s16 }
  0x17   : > { %3211 = sst [smem:[#allocation20_spill]] %s3210_s28  ;;  %s3196_s26 = smov 128  }
  0x18   : > { %p2527_p10 = pnand %p1923_p9, %p107_p1  ;;  %s3215_s8 = sld [smem:[#allocation29_spill]] }
  0x19   : > { %s353_s13 = sshll.u32 %s3212_s4, 4  ;;  %s3197_s29 = smov 8   ;;  %s354_s13 = int_to_ptr.hbm [resolvable:$true] %s353_s13 }
  0x1a   : > { %1926 = dma.hbm_to_vmem [thread:$0]  (!%p2527_p10), %s354_s13, 2048, %s356_s16, [#allocation6], %s3196_s26, %s3196_s26, %s3197_s29  }
  0x1b   : > { %s2405_s30 = smov [#allocation8]   ;;  %s3216_s7 = sld [smem:[#allocation28_spill]] }
  0x1c   : > { %s389_s15 = sshll.u32 %s2405_s30, 4  ;;  %s3217_s9 = sld [smem:[#allocation30_spill]]  ;;  %s390_s15 = int_to_ptr.vmem [resolvable:$true] %s389_s15 }
  0x1d   : > { %s2406_s16 = smov [#allocation7]   ;;  %s2407_s28 = smov [#allocation10]  }
  0x1e   : > { %s387_s20 = sshll.u32 %s3215_s8, 4  ;;  %s375_s4 = sshll.u32 %s2406_s16, 4  ;;  %s388_s20 = int_to_ptr.hbm [resolvable:$true] %s387_s20  ;;  %s376_s4 = int_to_ptr.vmem [resolvable:$true] %s375_s4 }
  0x1f   : > { %1932 = dma.hbm_to_vmem [thread:$0]  (!%p2527_p10), %s388_s20, 2048, %s390_s15, [#allocation9], %s3196_s26, %s3196_s26, %s3197_s29  }
  0x20   : > { %s403_s20 = sshll.u32 %s2407_s28, 4  ;;  %s2408_s30 = smov 256   ;;  %s404_s20 = int_to_ptr.vmem [resolvable:$true] %s403_s20 }
  0x21   : > { %s373_s21 = sshll.u32 %s3216_s7, 4  ;;  %s2409_s15 = smov 16   ;;  %s374_s21 = int_to_ptr.hbm [resolvable:$true] %s373_s21 }
  0x22   : > { %s401_s13 = sshll.u32 %s3217_s9, 4  ;;  %s2559_s18 = sadd.s32 1, %s2400_s24   ;;  %s402_s13 = int_to_ptr.hbm [resolvable:$true] %s401_s13 }
  0x23   : > { %1929 = dma.hbm_to_vmem [thread:$0]  (!%p2527_p10), %s374_s21, 2048, %s376_s4, [#allocation6], %s3196_s26, %s3196_s26, %s3197_s29  }
  0x24   : > { %1935 = dma.hbm_to_vmem [thread:$0]  (!%p2527_p10), %s402_s13, 4096, %s404_s20, [#allocation9], %s2408_s30, %s2408_s30, %s2409_s15  }
  0x25   : > { %s90_s19 = ssub.s32 %s2400_s24, %s2559_s18  ;;  %s93_s16 = sadd.s32 1, %s2396_s23 }
  0x26   : > { %p91_p12 = scmp.eq.s32.totalorder %s90_s19, 0  ;;  %p100_p13 = scmp.ne.s32.totalorder %s2396_s23, %s2392_s22 }
  0x27   : > { %p101_p0 = scmp.eq.s32.totalorder %s2400_s24, 0  ;;  %p1951_p7 = scmp.lt.s32.totalorder %s2400_s24, 2 }
  0x28   : > { %s2568_s7 = scalar_select %p91_p12, %s2396_s23, %s93_s16  }
  0x29   : > { %p102_p3 = por %p101_p0, %p100_p13  ;;  %p2572_p5 = por %p303_p2, %p100_p13 }
  0x2a   : > { %s434_s4 = sand.u32 1, %s2396_s23   ;;  %s1867_s13 = sshll.u32 %s2400_s24, 7 }
  0x2b   : > { %s1854_s17 = sshll.u32 %s434_s4, 7  ;;  %s443_s30 = scalar_lea.hbm %s3183_s2, %s1867_s13 }
  0x2c   : > { %s438_s15 = scalar_lea.vmem [#allocation2], %s1854_s17  ;;  %s444_s26 = sshll.u32 %s443_s30, 4  ;;  %s445_s26 = int_to_ptr.hbm [resolvable:$true] %s444_s26 }
  0x2d   : > { %s446_s19 = sshll.u32 %s438_s15, 4  ;;  %p2582_p9 = pnand %p1951_p7, %p102_p3  ;;  %s447_s19 = int_to_ptr.vmem [resolvable:$true] %s446_s19 }
  0x2e   : > { %s435_s29 = scalar_lea.sflag [#allocation3], %s434_s4  ;;  %s2264_s8 = sshra.s32 %s445_s26, 4  ;;  %s2265_s8 = int_to_ptr.hbm [resolvable:$true] %s2264_s8 }
  0x2f   : > { %s2266_s9 = scalar_lea.hbm %s2265_s8, 128  ;;  %p2268_p10 = pneg %p2582_p9 }
  0x30   : > { %p2267_p2 = scmp.ne.s32.totalorder %s2265_s8, %s2266_s9  ;;  %s2271_s28 = scalar_lea.hbm %s3183_s2, 256 }
  0x31   : > { %p2272_p0 = scmp.lt.s32.totalorder %s2265_s8, %s3183_s2  ;;  %p2273_p3 = scmp.lt.s32.totalorder %s2271_s28, %s2266_s9 }
  0x32   : > { %p2269_p12 = pnand %p2268_p10, %p2267_p2 }
  0x33   : > { %p2274_p7 = por %p2273_p3, %p2272_p0 }
  0x34   : > { %p2270_p13 = pneg %p2269_p12 }
  0x36   : > { %p2275_p11 = pnand %p2274_p7, %p2270_p13 }
  0x38   : > { %2278 = shalt.err (!%p2275_p11)
}
  0x39   : > { %s3220_s4 = smov 8   ;;  %s3221_s15 = smov 128  }
  0x3a   : > { %1939 = dma.hbm_to_vmem [thread:$0]  (!%p2582_p9), %s445_s26, 2048, %s447_s19, %s435_s29, %s3221_s15, %s3221_s15, %s3220_s4  }
  0x3b   : > { %464 = sbr.rel (%p2519_p8) target bundleno = 2966 (0xb96), region = 64 }
  0x40   : > { %s2602_s13 = sand.u32 1, %s2392_s22  }
  0x41   : > { %s1858_s8 = sshll.u32 %s2602_s13, 7  ;;  %s467_s9 = scalar_lea.sflag [#allocation3], %s2602_s13 }
  0x42   : > { %s2606_s17 = scalar_lea.vmem [#allocation2], %s1858_s8 }
  0x43   : > { %2367 = dma.done.wait (%p2506_p4), %s467_s9, 2048  }
  0x44   : > { %2369 = vsyncadd (%p2506_p4), %s467_s9, 4294965248 }
  0x45   : > { %2371 = dma.done.wait (%p107_p1), [#allocation6], 4096  }
  0x46   : > { %2373 = vsyncadd (%p107_p1), [#allocation6], 4294963200 }
  0x47   : > { %2375 = dma.done.wait (%p107_p1), [#allocation9], 6144  }
  0x48   : > { %2377 = vsyncadd (%p107_p1), [#allocation9], 4294961152  ;;  %p546_p8 = scmp.lt.s32.totalorder %s2497_s25, 1  ;;  %v2410_v0 = vmov 0   ;;  %v622_v2 = vld [vmem:[%s3186_s5 + $0x78] sm:$0xff]  ;;  %v620_v6 = vld [vmem:[%s3186_s5 + $0x68] sm:$0xff] }
  0x49   : > { %1998 = vset.pattern.permute.xlu0 %v2410_v0  ;;  %1999 = vset.pattern.permute.xlu1 %v2410_v0  ;;  %v621_v8 = vld [vmem:[%s3186_s5 + $0x70] sm:$0xff]  ;;  %v618_v10 = vld [vmem:[%s3186_s5 + $0x58] sm:$0xff]  ;;  %v619_v12 = vld [vmem:[%s3186_s5 + $0x60] sm:$0xff]  ;;  %vm889_vm0 = vcmask 1040384   ;;  %s1656_s4 = scalar_lea.sflag [#allocation4], %s2602_s13  ;;  %s2314_s26 = scalar_lea.hbm %s3192_s11, 2 }
  0x4a   : > { %s2622_s27 = scalar_select %p546_p8, %s2497_s25, 1  ;;  %2000 = vset.pattern.permute.xlu2 %v2410_v0  ;;  %781 = vperm.xlu0 %1998, %v622_v2   ;;  %v616_v15 = vld [vmem:[%s3186_s5 + $0x48] sm:$0xff]  ;;  %v617_v17 = vld [vmem:[%s3186_s5 + $0x50] sm:$0xff]  ;;  %v615_v19 = vld [vmem:[%s3186_s5 + $0x40] sm:$0xff] }
  0x4b   : > { %771 = vperm.xlu1 %1999, %v620_v6   ;;  %761 = vperm.xlu2 %2000, %v618_v10   ;;  %v613_v22 = vld [vmem:[%s3186_s5 + $0x30] sm:$0xff]  ;;  %v614_v24 = vld [vmem:[%s3186_s5 + $0x38] sm:$0xff]  ;;  %v612_v26 = vld [vmem:[%s3186_s5 + $0x28] sm:$0xff] }
  0x4c   : > { %s1868_s14 = sshll.u32 %s2622_s27, 7  ;;  %v591_v28 = vld [vmem:[#allocation5] sm:$0xff]  ;;  %v602_v29 = vld [vmem:[#allocation5 + $0x58] sm:$0xff]  ;;  %v609_v32 = vld [vmem:[%s3186_s5 + $0x10] sm:$0xff]  ;;  %s553_s20 = scalar_lea.vmem %s3182_s1, %s2622_s27 }
  0x4d   : > { %s2628_s19 = scalar_lea.vmem %s3181_s0, %s1868_s14  ;;  %v610_v30 = vld [vmem:[%s3186_s5 + $0x18] sm:$0xff]  ;;  %v611_v31 = vld [vmem:[%s3186_s5 + $0x20] sm:$0xff]  ;;  %v592_v33 = vld [vmem:[#allocation5 + $0x8] sm:$0xff]  ;;  %s556_s30 = scalar_lea.vmem %s3184_s3, %s2622_s27 }
  0x4e   : > { %v2631_v1 = vld [vmem:[%s2628_s19 + $0x78] sm:$0xff]  ;;  %v2637_v3 = vld [vmem:[%s2628_s19 + $0x70] sm:$0xff]  ;;  %v2642_v4 = vld [vmem:[%s2628_s19 + $0x68] sm:$0xff]  ;;  %s539_s27 = scalar_lea.vmem [#allocation11], %s2602_s13 }
  0x4f   : > { %784 = vmatpush.msra.mxu0 %v2631_v1  ;;  %1869 = vmatpush.msra.mxu3 %v2631_v1  ;;  %v2647_v5 = vld [vmem:[%s2628_s19 + $0x60] sm:$0xff]  ;;  %v2655_v7 = vld [vmem:[%s2628_s19 + $0x58] sm:$0xff]  ;;  %v2663_v9 = vld [vmem:[%s2628_s19 + $0x50] sm:$0xff] }
  0x50   : > { %v2671_v11 = vld [vmem:[%s2628_s19 + $0x48] sm:$0xff]  ;;  %v2679_v13 = vld [vmem:[%s2628_s19 + $0x40] sm:$0xff]  ;;  %v2684_v14 = vld [vmem:[%s2628_s19 + $0x38] sm:$0xff] }
  0x51   : > { %785 = vmatpush.msra.mxu0 %v2637_v3  ;;  %1870 = vmatpush.msra.mxu3 %v2637_v3  ;;  %v2692_v16 = vld [vmem:[%s2628_s19 + $0x30] sm:$0xff]  ;;  %v2700_v18 = vld [vmem:[%s2628_s19 + $0x28] sm:$0xff]  ;;  %v2708_v20 = vld [vmem:[%s2628_s19 + $0x20] sm:$0xff] }
  0x52   : > { %776 = vperm.xlu0 %1998, %v621_v8   ;;  %v2713_v21 = vld [vmem:[%s2628_s19 + $0x18] sm:$0xff]  ;;  %v2721_v23 = vld [vmem:[%s2628_s19 + $0x10] sm:$0xff]  ;;  %v2729_v25 = vld [vmem:[%s2628_s19 + $0x8] sm:$0xff] }
  0x53   : > { %786 = vmatpush.msra.mxu0 %v2642_v4  ;;  %1871 = vmatpush.msra.mxu3 %v2642_v4  ;;  %v2737_v27 = vld [vmem:[%s2628_s19] sm:$0xff]  ;;  %v608_v36 = vld [vmem:[%s3186_s5 + $0x8] sm:$0xff]  ;;  %v593_v37 = vld [vmem:[#allocation5 + $0x10] sm:$0xff]  ;;  %s1670_s19 = sshll.u32 %s539_s27, 4  ;;  %s1671_s19 = int_to_ptr.vmem [resolvable:$true] %s1670_s19 }
  0x54   : > { %766 = vperm.xlu1 %1999, %v619_v12   ;;  %756 = vperm.xlu2 %2000, %v617_v17   ;;  %v603_v34 = vld [vmem:[#allocation5 + $0x60] sm:$0xff]  ;;  %v604_v38 = vld [vmem:[#allocation5 + $0x68] sm:$0xff]  ;;  %v594_v39 = vld [vmem:[#allocation5 + $0x18] sm:$0xff] }
  0x55   : > { %787 = vmatpush.msra.mxu0 %v2647_v5  ;;  %1872 = vmatpush.msra.mxu3 %v2647_v5  ;;  %v607_v35 = vld [vmem:[%s3186_s5] sm:$0xff]  ;;  %v605_v40 = vld [vmem:[#allocation5 + $0x70] sm:$0xff]  ;;  %v606_v42 = vld [vmem:[#allocation5 + $0x78] sm:$0xff] }
  0x56   : > { %v595_v41 = vld [vmem:[#allocation5 + $0x20] sm:$0xff]  ;;  %v596_v43 = vld [vmem:[#allocation5 + $0x28] sm:$0xff]  ;;  %v597_v44 = vld [vmem:[#allocation5 + $0x30] sm:$0xff] }
  0x57   : > { %788 = vmatpush.msra.mxu0 %v2655_v7  ;;  %1873 = vmatpush.msra.mxu3 %v2655_v7  ;;  %v598_v45 = vld [vmem:[#allocation5 + $0x38] sm:$0xff]  ;;  %v599_v46 = vld [vmem:[#allocation5 + $0x40] sm:$0xff]  ;;  %v600_v47 = vld [vmem:[#allocation5 + $0x48] sm:$0xff] }
  0x58   : > { %v601_v48 = vld [vmem:[#allocation5 + $0x50] sm:$0xff] }
  0x59   : > { %789 = vmatpush.msra.mxu0 %v2663_v9  ;;  %1874 = vmatpush.msra.mxu3 %v2663_v9 }
  0x5a   : > { %751 = vperm.xlu0 %1998, %v616_v15  }
  0x5b   : > { %790 = vmatpush.msra.mxu0 %v2671_v11  ;;  %1875 = vmatpush.msra.mxu3 %v2671_v11 }
  0x5c   : > { %746 = vperm.xlu1 %1999, %v615_v19   ;;  %741 = vperm.xlu2 %2000, %v614_v24  }
  0x5d   : > { %791 = vmatpush.msra.mxu0 %v2679_v13  ;;  %1876 = vmatpush.msra.mxu3 %v2679_v13 }
  0x5f   : > { %792 = vmatpush.msra.mxu0 %v2684_v14  ;;  %1877 = vmatpush.msra.mxu3 %v2684_v14 }
  0x61   : > { %793 = vmatpush.msra.mxu0 %v2692_v16  ;;  %1878 = vmatpush.msra.mxu3 %v2692_v16 }
  0x62   : > { %736 = vperm.xlu0 %1998, %v613_v22  }
  0x63   : > { %794 = vmatpush.msra.mxu0 %v2700_v18  ;;  %1879 = vmatpush.msra.mxu3 %v2700_v18 }
  0x64   : > { %731 = vperm.xlu1 %1999, %v612_v26   ;;  %726 = vperm.xlu2 %2000, %v611_v31  }
  0x65   : > { %795 = vmatpush.msra.mxu0 %v2708_v20  ;;  %1880 = vmatpush.msra.mxu3 %v2708_v20 }
  0x67   : > { %796 = vmatpush.msra.mxu0 %v2713_v21  ;;  %1881 = vmatpush.msra.mxu3 %v2713_v21 }
  0x69   : > { %797 = vmatpush.msra.mxu0 %v2721_v23  ;;  %1882 = vmatpush.msra.mxu3 %v2721_v23 }
  0x6a   : > { %721 = vperm.xlu0 %1998, %v610_v30  }
  0x6b   : > { %798 = vmatpush.msra.mxu0 %v2729_v25  ;;  %1883 = vmatpush.msra.mxu3 %v2729_v25 }
  0x6c   : > { %716 = vperm.xlu1 %1999, %v609_v32   ;;  %711 = vperm.xlu2 %2000, %v608_v36  }
  0x6d   : > { %799 = vmatpush.msra.mxu0 %v2737_v27  ;;  %1884 = vmatpush.msra.mxu3 %v2737_v27 }
  0x6e   : > { %800 = vmatmul.f32.vlgmr.msra.gmra.mxu0 %v591_v28  ;;  %833 = vmatmul.f32.vlgmr.msra.gmra.mxu3 %v602_v29 }
  0x72   : > { %706 = vperm.xlu0 %1998, %v607_v35  }
  0x76   : > { %803 = vmatmul.f32.gmra.mxu0 %v592_v33  ;;  %836 = vmatmul.f32.gmra.mxu3 %v603_v34 }
  0x7e   : > { %806 = vmatmul.f32.gmra.mxu0 %v593_v37  ;;  %839 = vmatmul.f32.gmra.mxu3 %v604_v38 }
  0x86   : > { %809 = vmatmul.f32.gmra.mxu0 %v594_v39  ;;  %842 = vmatmul.f32.gmra.mxu3 %v605_v40 }
  0x8e   : > { %812 = vmatmul.f32.gmra.mxu0 %v595_v41  ;;  %845 = vmatmul.f32.gmra.mxu3 %v606_v42 }
  0x96   : > { %815 = vmatmul.f32.gmra.mxu0 %v596_v43 }
  0x9e   : > { %818 = vmatmul.f32.gmra.mxu0 %v597_v44 }
  0xa5   : > { %v762_v10 = vpop.permute.xlu2 %761 }
  0xa6   : > { %821 = vmatmul.f32.gmra.mxu0 %v598_v45 }
  0xae   : > { %824 = vmatmul.f32.gmra.mxu0 %v599_v46  ;;  %v757_v29 = vpop.permute.xlu2 %756 }
  0xb6   : > { %827 = vmatmul.f32.gmra.mxu0 %v600_v47  ;;  %v742_v34 = vpop.permute.xlu2 %741 }
  0xbc   : > { %v782_v56 = vpop.permute.xlu0 %781 }
  0xbd   : > { %v772_v57 = vpop.permute.xlu1 %771 }
  0xbe   : > { %830 = vmatmul.f32.gmra.mxu0 %v601_v48  ;;  %v727_v41 = vpop.permute.xlu2 %726 }
  0xc4   : > { %v777_v60 = vpop.permute.xlu0 %776 }
  0xc6   : > { %v767_v2 = vpop.permute.xlu1 %766 }
  0xcc   : > { %v752_v31 = vpop.permute.xlu0 %751 }
  0xce   : > { %v747_v32 = vpop.permute.xlu1 %746 }
  0xd4   : > { %v737_v35 = vpop.permute.xlu0 %736 }
  0xd6   : > { %v732_v39 = vpop.permute.xlu1 %731 }
  0xdc   : > { %v722_v43 = vpop.permute.xlu0 %721 }
  0xeb   : > { %v2758_v49 = vpop.f32.mrf.mxu0 }
  0xf1   : > { %v834_v50 = vpop.f32.mrf.mxu3 }
  0xf2   : > { %v835_v12 = vadd.f32 %v834_v50, %v762_v10  ;;  %v717_v50 = vpop.permute.xlu1 %716 }
  0xf3   : > { %v2760_v51 = vpop.f32.mrf.mxu0 }
  0xf9   : > { %v837_v52 = vpop.f32.mrf.mxu3 }
  0xfa   : > { %v838_v8 = vadd.f32 %v837_v52, %v767_v2 }
  0xfb   : > { %v2762_v53 = vpop.f32.mrf.mxu0 }
 0x101   : > { %v840_v54 = vpop.f32.mrf.mxu3 }
 0x102   : > { %v841_v63 = vadd.f32 %v840_v54, %v772_v57 }
 0x103   : > { %v810_v55 = vpop.f32.mrf.mxu0 }
 0x104   : > { %v811_v54 = vadd.f32 %v810_v55, %v722_v43 }
 0x109   : > { %v843_v58 = vpop.f32.mrf.mxu3 }
 0x10a   : > { %v844_v61 = vadd.f32 %v843_v58, %v777_v60  ;;  %v808_v58 = vadd.f32 %v2762_v53, %v717_v50  ;;  %v707_v60 = vpop.permute.xlu0 %706  ;;  %v2815_v50 = vld [vmem:[%s2606_s17 + $0x58] sm:$0xff] }
 0x10b   : > { %v813_v59 = vpop.f32.mrf.mxu0 }
 0x10c   : > { %2001 = vtanh.f32 %v844_v61  ;;  %v814_v48 = vadd.f32 %v813_v59, %v727_v41 }
 0x111   : > { %v846_v62 = vpop.f32.mrf.mxu3 }
 0x112   : > { %v847_v0 = vadd.f32 %v846_v62, %v782_v56  ;;  %v2002_v15 = vpop.eup %2001  ;;  %v712_v56 = vpop.permute.xlu2 %711 }
 0x113   : > { %v816_v6 = vpop.f32.mrf.mxu0  ;;  %v805_v62 = vadd.f32 %v2760_v51, %v712_v56  ;;  %v2770_v51 = vld [vmem:[%s3187_s6] sm:$0x1] }
 0x114   : > { %2003 = vtanh.f32 %v847_v0  ;;  %v817_v46 = vadd.f32 %v816_v6, %v732_v39 }
 0x115   : > { %2005 = vtanh.f32 %v841_v63  ;;  %v802_v63 = vadd.f32 %v2758_v49, %v707_v60  ;;  %v589_v49 = vld [vmem:[%s553_s20] sm:$0x1]  ;;  %v2847_v60 = vld [vmem:[%s2606_s17 + $0x30] sm:$0xff] }
 0x116   : > { %2007 = vtanh.f32 %v838_v8  ;;  %v886_v8 = vsub.f32 1.0, %v589_v49 }
 0x117   : > { %2009 = vtanh.f32 %v835_v12 }
 0x118   : > { %v887_v10 = vmul.f32 -1e+30, %v886_v8  ;;  %v639_v8 = vld [vmem:[#allocation7 + $0x78] sm:$0xff] }
 0x11a   : > { %v2004_v17 = vpop.eup %2003 }
 0x11b   : > { %v819_v19 = vpop.f32.mrf.mxu0  ;;  %865 = vmatpush.msra.mxu1 %v2004_v17  ;;  %v2006_v22 = vpop.eup %2005 }
 0x11c   : > { %v2008_v24 = vpop.eup %2007  ;;  %v820_v44 = vadd.f32 %v819_v19, %v737_v35 }
 0x11d   : > { %866 = vmatpush.msra.mxu1 %v2002_v15  ;;  %v2010_v26 = vpop.eup %2009 }
 0x11f   : > { %867 = vmatpush.msra.mxu1 %v2006_v22 }
 0x121   : > { %868 = vmatpush.msra.mxu1 %v2008_v24 }
 0x123   : > { %v822_v28 = vpop.f32.mrf.mxu0  ;;  %869 = vmatpush.msra.mxu1 %v2010_v26 }
 0x124   : > { %v823_v42 = vadd.f32 %v822_v28, %v742_v34 }
 0x12b   : > { %v825_v30 = vpop.f32.mrf.mxu0 }
 0x12c   : > { %v826_v40 = vadd.f32 %v825_v30, %v747_v32 }
 0x133   : > { %v828_v33 = vpop.f32.mrf.mxu0 }
 0x134   : > { %v829_v37 = vadd.f32 %v828_v33, %v752_v31 }
 0x13b   : > { %v831_v36 = vpop.f32.mrf.mxu0 }
 0x13c   : > { %v832_v38 = vadd.f32 %v831_v36, %v757_v29 }
 0x13e   : > { %2011 = vtanh.f32 %v832_v38 }
 0x13f   : > { %2013 = vtanh.f32 %v829_v37 }
 0x140   : > { %2015 = vtanh.f32 %v826_v40 }
 0x141   : > { %2017 = vtanh.f32 %v823_v42 }
 0x142   : > { %2019 = vtanh.f32 %v820_v44 }
 0x143   : > { %2021 = vtanh.f32 %v817_v46 }
 0x144   : > { %v2012_v45 = vpop.eup %2011  ;;  %2023 = vtanh.f32 %v814_v48  ;;  %v2797_v48 = vld [vmem:[%s2606_s17 + $0x70] sm:$0xff] }
 0x145   : > { %870 = vmatpush.msra.mxu1 %v2012_v45  ;;  %v2014_v47 = vpop.eup %2013  ;;  %2025 = vtanh.f32 %v811_v54  ;;  %v2822_v54 = vld [vmem:[%s2606_s17 + $0x50] sm:$0xff] }
 0x146   : > { %v2016_v52 = vpop.eup %2015  ;;  %2027 = vtanh.f32 %v808_v58 }
 0x147   : > { %871 = vmatpush.msra.mxu1 %v2014_v47  ;;  %v2018_v57 = vpop.eup %2017  ;;  %2029 = vtanh.f32 %v805_v62  ;;  %v2865_v62 = vld [vmem:[%s2606_s17 + $0x18] sm:$0xff] }
 0x148   : > { %v2020_v61 = vpop.eup %2019  ;;  %2031 = vtanh.f32 %v802_v63  ;;  %v2872_v63 = vld [vmem:[%s2606_s17 + $0x10] sm:$0xff] }
 0x149   : > { %872 = vmatpush.msra.mxu1 %v2016_v52  ;;  %v2022_v59 = vpop.eup %2021 }
 0x14a   : > { %v2024_v55 = vpop.eup %2023 }
 0x14b   : > { %873 = vmatpush.msra.mxu1 %v2018_v57  ;;  %v2026_v0 = vpop.eup %2025  ;;  %v2840_v57 = vld [vmem:[%s2606_s17 + $0x38] sm:$0xff] }
 0x14c   : > { %v2028_v53 = vpop.eup %2027 }
 0x14d   : > { %874 = vmatpush.msra.mxu1 %v2020_v61  ;;  %v2030_v2 = vpop.eup %2029 }
 0x14e   : > { %v2032_v6 = vpop.eup %2031 }
 0x14f   : > { %875 = vmatpush.msra.mxu1 %v2022_v59 }
 0x151   : > { %876 = vmatpush.msra.mxu1 %v2024_v55  ;;  %v635_v55 = vld [vmem:[#allocation7 + $0x58] sm:$0xff] }
 0x153   : > { %877 = vmatpush.msra.mxu1 %v2026_v0  ;;  %v636_v0 = vld [vmem:[#allocation7 + $0x60] sm:$0xff] }
 0x155   : > { %878 = vmatpush.msra.mxu1 %v2028_v53  ;;  %v637_v53 = vld [vmem:[#allocation7 + $0x68] sm:$0xff] }
 0x157   : > { %879 = vmatpush.msra.mxu1 %v2030_v2 }
 0x159   : > { %880 = vmatpush.msra.mxu1 %v2032_v6 }
 0x15a   : > { %881 = vmatmul.f32.vlgmr.msra.gmra.mxu1 %v2770_v51 }
 0x1d7   : > { %v882_v12 = vpop.f32.mrf.mxu1 }
 0x1d8   : > { %v885_v15 = vmul.f32 %v882_v12, %v589_v49 }
 0x1da   : > { %v888_v17 = vadd.f32 %v887_v10, %v885_v15 }
 0x1dc   : > { %v890_v19 = vsel %vm889_vm0, %v888_v17, -inf }
 0x1dd   : > { %891 = vmax.xlane.f32.xlu1 %v890_v19 }
 0x250   : > { %v892_v22 = vpop.xlane.xlu1 %891 }
 0x251   : > { %v893_v24 = vsub.f32 %v888_v17, %v892_v22 }
 0x253   : > { %v894_v26 = vmul.f32 1.442695, %v893_v24 }
 0x255   : > { %2033 = vpow2.f32 %v894_v26 }
 0x25b   : > { %v2034_v28 = vpop.eup %2033 }
 0x25c   : > { %v896_v29 = vsel %vm889_vm0, %v2034_v28, 0.0 }
 0x25d   : > { %897 = vadd.xlane.f32.xlu2 %v896_v29 }
 0x2d0   : > { %v898_v30 = vpop.xlane.xlu2 %897 }
 0x2d1   : > { %2035 = vrcp.f32 %v898_v30  ;;  %v910_v34 = vand.u32 2147483648, %v898_v30  ;;  %v908_v36 = vand.u32 2147483647, %v898_v30  ;;  %vm904_vm2 = vweird.f32 %v898_v30 }
 0x2d3   : > { %v911_v38 = vor.u32 1.1754944e-38, %v910_v34  ;;  %vm909_vm4 = vcmp.eq.f32.partialorder %v908_v36, 8.507059e+37  ;;  %v2896_v34 = vld [vmem:[#allocation8 + $0x8] sm:$0xff]  ;;  %v2902_v36 = vld [vmem:[#allocation8 + $0x18] sm:$0xff] }
 0x2d7   : > { %v2036_v31 = vpop.eup %2035 }
 0x2d8   : > { %v900_v32 = vmul.f32 %v2036_v31, %v898_v30  ;;  %vm905_vm1 = vweird.f32 %v2036_v31 }
 0x2d9   : > { %vm906_vm3 = vmor %vm904_vm2, %vm905_vm1 }
 0x2da   : > { %v901_v33 = vsub.f32 1.0, %v900_v32  ;;  %v2893_v32 = vld [vmem:[#allocation8] sm:$0xff] }
 0x2dc   : > { %v902_v35 = vmul.f32 %v2036_v31, %v901_v33 }
 0x2de   : > { %v903_v37 = vadd.f32 %v2036_v31, %v902_v35  ;;  %v2899_v35 = vld [vmem:[#allocation8 + $0x10] sm:$0xff] }
 0x2e0   : > { %v907_v39 = vsel %vm906_vm3, %v2036_v31, %v903_v37  ;;  %v2905_v37 = vld [vmem:[#allocation8 + $0x20] sm:$0xff] }
 0x2e1   : > { %v912_v40 = vsel %vm909_vm4, %v911_v38, %v907_v39  ;;  %v2908_v38 = vld [vmem:[#allocation8 + $0x28] sm:$0xff]  ;;  %v2911_v39 = vld [vmem:[#allocation8 + $0x30] sm:$0xff] }
 0x2e2   : > { %v913_v41 = vmul.f32 %v2034_v28, %v912_v40  ;;  %v2914_v40 = vld [vmem:[#allocation8 + $0x38] sm:$0xff] }
 0x2e4   : > { %v2779_v42 = vperm.slane %v913_v41, 0  ;;  %v2917_v41 = vld [vmem:[#allocation8 + $0x40] sm:$0xff] }
 0x2e6   : > { %v932_v43 = vmul.f32 %v2779_v42, %v2631_v1  ;;  %v931_v44 = vmul.f32 %v2779_v42, %v2637_v3  ;;  %v930_v45 = vmul.f32 %v2779_v42, %v2642_v4  ;;  %v929_v46 = vmul.f32 %v2779_v42, %v2647_v5  ;;  %v2794_v3 = vld [vmem:[%s2606_s17 + $0x78] sm:$0xff]  ;;  %v2801_v4 = vld [vmem:[%s2606_s17 + $0x68] sm:$0xff]  ;;  %v2806_v5 = vld [vmem:[%s2606_s17 + $0x60] sm:$0xff] }
 0x2e7   : > { %v928_v47 = vmul.f32 %v2779_v42, %v2655_v7  ;;  %v927_v1 = vmul.f32 %v2779_v42, %v2663_v9  ;;  %1885 = vmatpush.msrb.mxu3 %v2794_v3  ;;  %965 = vmatpush.msra.mxu2 %v2794_v3  ;;  %v926_v7 = vmul.f32 %v2779_v42, %v2671_v11  ;;  %v2826_v11 = vld [vmem:[%s2606_s17 + $0x48] sm:$0xff] }
 0x2e8   : > { %963 = vadd.xlane.f32.xlu0 %v932_v43  ;;  %961 = vadd.xlane.f32.xlu2 %v931_v44  ;;  %v925_v9 = vmul.f32 %v2779_v42, %v2679_v13  ;;  %v924_v52 = vmul.f32 %v2779_v42, %v2684_v14  ;;  %v2831_v13 = vld [vmem:[%s2606_s17 + $0x40] sm:$0xff]  ;;  %v923_v14 = vmul.f32 %v2779_v42, %v2692_v16  ;;  %v2851_v16 = vld [vmem:[%s2606_s17 + $0x28] sm:$0xff]  ;;  %v2923_v43 = vld [vmem:[#allocation8 + $0x50] sm:$0xff] }
 0x2e9   : > { %959 = vadd.xlane.f32.xlu1 %v930_v45  ;;  %1886 = vmatpush.msrb.mxu3 %v2797_v48  ;;  %v922_v56 = vmul.f32 %v2779_v42, %v2700_v18  ;;  %v921_v58 = vmul.f32 %v2779_v42, %v2708_v20  ;;  %v2856_v18 = vld [vmem:[%s2606_s17 + $0x20] sm:$0xff]  ;;  %v920_v20 = vmul.f32 %v2779_v42, %v2713_v21  ;;  %v2876_v21 = vld [vmem:[%s2606_s17 + $0x8] sm:$0xff]  ;;  %v2928_v45 = vld [vmem:[#allocation8 + $0x58] sm:$0xff] }
 0x2ea   : > { %966 = vmatpush.msra.mxu2 %v2797_v48  ;;  %v919_v61 = vmul.f32 %v2779_v42, %v2721_v23  ;;  %v918_v59 = vmul.f32 %v2779_v42, %v2729_v25  ;;  %v2881_v23 = vld [vmem:[%s2606_s17] sm:$0xff]  ;;  %v917_v25 = vmul.f32 %v2779_v42, %v2737_v27  ;;  %v638_v27 = vld [vmem:[#allocation7 + $0x70] sm:$0xff]  ;;  %v2920_v42 = vld [vmem:[#allocation8 + $0x48] sm:$0xff]  ;;  %s1668_s17 = scalar_lea.hbm %s3192_s11, %s2497_s25 }
 0x2eb   : > { %1887 = vmatpush.msrb.mxu3 %v2801_v4 }
 0x2ec   : > { %967 = vmatpush.msra.mxu2 %v2801_v4 }
 0x2ed   : > { %1888 = vmatpush.msrb.mxu3 %v2806_v5 }
 0x2ee   : > { %968 = vmatpush.msra.mxu2 %v2806_v5 }
 0x2ef   : > { %1889 = vmatpush.msrb.mxu3 %v2815_v50 }
 0x2f0   : > { %957 = vadd.xlane.f32.xlu2 %v929_v46  ;;  %955 = vadd.xlane.f32.xlu0 %v928_v47  ;;  %v624_v46 = vld [vmem:[#allocation7] sm:$0xff] }
 0x2f1   : > { %953 = vadd.xlane.f32.xlu1 %v927_v1  ;;  %1890 = vmatpush.msrb.mxu3 %v2822_v54  ;;  %v2933_v1 = vld [vmem:[#allocation8 + $0x60] sm:$0xff] }
 0x2f2   : > { %969 = vmatpush.msra.mxu2 %v2815_v50 }
 0x2f3   : > { %1891 = vmatpush.msrb.mxu3 %v2826_v11 }
 0x2f4   : > { %970 = vmatpush.msra.mxu2 %v2822_v54 }
 0x2f5   : > { %1892 = vmatpush.msrb.mxu3 %v2831_v13 }
 0x2f6   : > { %971 = vmatpush.msra.mxu2 %v2826_v11 }
 0x2f7   : > { %1893 = vmatpush.msrb.mxu3 %v2840_v57 }
 0x2f8   : > { %951 = vadd.xlane.f32.xlu2 %v926_v7  ;;  %949 = vadd.xlane.f32.xlu0 %v925_v9  ;;  %v625_v7 = vld [vmem:[#allocation7 + $0x8] sm:$0xff] }
 0x2f9   : > { %947 = vadd.xlane.f32.xlu1 %v924_v52  ;;  %1894 = vmatpush.msrb.mxu3 %v2847_v60  ;;  %v2936_v9 = vld [vmem:[#allocation8 + $0x68] sm:$0xff] }
 0x2fa   : > { %972 = vmatpush.msra.mxu2 %v2831_v13 }
 0x2fb   : > { %1895 = vmatpush.msrb.mxu3 %v2851_v16 }
 0x2fc   : > { %973 = vmatpush.msra.mxu2 %v2840_v57 }
 0x2fd   : > { %1896 = vmatpush.msrb.mxu3 %v2856_v18 }
 0x2fe   : > { %974 = vmatpush.msra.mxu2 %v2847_v60 }
 0x2ff   : > { %1897 = vmatpush.msrb.mxu3 %v2865_v62 }
 0x300   : > { %945 = vadd.xlane.f32.xlu2 %v923_v14  ;;  %943 = vadd.xlane.f32.xlu0 %v922_v56  ;;  %v626_v14 = vld [vmem:[#allocation7 + $0x10] sm:$0xff] }
 0x301   : > { %941 = vadd.xlane.f32.xlu1 %v921_v58  ;;  %1898 = vmatpush.msrb.mxu3 %v2872_v63  ;;  %v2941_v56 = vld [vmem:[#allocation8 + $0x70] sm:$0xff] }
 0x302   : > { %975 = vmatpush.msra.mxu2 %v2851_v16 }
 0x303   : > { %1899 = vmatpush.msrb.mxu3 %v2876_v21 }
 0x304   : > { %976 = vmatpush.msra.mxu2 %v2856_v18 }
 0x305   : > { %1900 = vmatpush.msrb.mxu3 %v2881_v23 }
 0x306   : > { %977 = vmatpush.msra.mxu2 %v2865_v62  ;;  %1014 = vmatmul.f32.vlgmr.msrb.gmra.mxu3 %v635_v55 }
 0x308   : > { %939 = vadd.xlane.f32.xlu2 %v920_v20  ;;  %937 = vadd.xlane.f32.xlu0 %v919_v61  ;;  %v627_v20 = vld [vmem:[#allocation7 + $0x18] sm:$0xff] }
 0x309   : > { %935 = vadd.xlane.f32.xlu1 %v918_v59  ;;  %978 = vmatpush.msra.mxu2 %v2872_v63  ;;  %v2946_v61 = vld [vmem:[#allocation8 + $0x78] sm:$0xff] }
 0x30b   : > { %979 = vmatpush.msra.mxu2 %v2876_v21 }
 0x30d   : > { %980 = vmatpush.msra.mxu2 %v2881_v23 }
 0x30e   : > { %1017 = vmatmul.f32.gmra.mxu3 %v636_v0  ;;  %981 = vmatmul.f32.vlgmr.msra.gmra.mxu2 %v624_v46  ;;  %v629_v0 = vld [vmem:[#allocation7 + $0x28] sm:$0xff] }
 0x310   : > { %933 = vadd.xlane.f32.xlu2 %v917_v25  ;;  %v628_v25 = vld [vmem:[#allocation7 + $0x20] sm:$0xff] }
 0x316   : > { %1020 = vmatmul.f32.gmra.mxu3 %v637_v53  ;;  %984 = vmatmul.f32.gmra.mxu2 %v625_v7 }
 0x31e   : > { %1023 = vmatmul.f32.gmra.mxu3 %v638_v27  ;;  %987 = vmatmul.f32.gmra.mxu2 %v626_v14  ;;  %v630_v27 = vld [vmem:[#allocation7 + $0x30] sm:$0xff] }
 0x326   : > { %1026 = vmatmul.f32.gmra.mxu3 %v639_v8  ;;  %990 = vmatmul.f32.gmra.mxu2 %v627_v20  ;;  %v632_v8 = vld [vmem:[#allocation7 + $0x40] sm:$0xff] }
 0x32e   : > { %993 = vmatmul.f32.gmra.mxu2 %v628_v25 }
 0x336   : > { %996 = vmatmul.f32.gmra.mxu2 %v629_v0 }
 0x33e   : > { %999 = vmatmul.f32.gmra.mxu2 %v630_v27 }
 0x35b   : > { %v964_v2 = vpop.xlane.xlu0 %963  ;;  %v962_v6 = vpop.xlane.xlu2 %961 }
 0x35c   : > { %v960_v49 = vpop.xlane.xlu1 %959  ;;  %1030 = vmatpush.msra.mxu3 %v964_v2  ;;  %1361 = vmatpush.msrb.mxu0 %v964_v2 }
 0x35e   : > { %1031 = vmatpush.msra.mxu3 %v962_v6  ;;  %1362 = vmatpush.msrb.mxu0 %v962_v6  ;;  %v631_v6 = vld [vmem:[#allocation7 + $0x38] sm:$0xff] }
 0x35f   : > { %1002 = vmatmul.f32.gmra.mxu2 %v631_v6 }
 0x360   : > { %1032 = vmatpush.msra.mxu3 %v960_v49  ;;  %1363 = vmatpush.msrb.mxu0 %v960_v49 }
 0x363   : > { %v958_v10 = vpop.xlane.xlu2 %957  ;;  %v956_v12 = vpop.xlane.xlu0 %955 }
 0x364   : > { %v954_v15 = vpop.xlane.xlu1 %953  ;;  %1033 = vmatpush.msra.mxu3 %v958_v10  ;;  %1364 = vmatpush.msrb.mxu0 %v958_v10 }
 0x366   : > { %1034 = vmatpush.msra.mxu3 %v956_v12  ;;  %1365 = vmatpush.msrb.mxu0 %v956_v12  ;;  %v633_v12 = vld [vmem:[#allocation7 + $0x48] sm:$0xff] }
 0x367   : > { %1005 = vmatmul.f32.gmra.mxu2 %v632_v8 }
 0x368   : > { %1035 = vmatpush.msra.mxu3 %v954_v15  ;;  %1366 = vmatpush.msrb.mxu0 %v954_v15 }
 0x36b   : > { %v952_v17 = vpop.xlane.xlu2 %951  ;;  %v950_v19 = vpop.xlane.xlu0 %949 }
 0x36c   : > { %v948_v22 = vpop.xlane.xlu1 %947  ;;  %1036 = vmatpush.msra.mxu3 %v952_v17  ;;  %1367 = vmatpush.msrb.mxu0 %v952_v17 }
 0x36e   : > { %1037 = vmatpush.msra.mxu3 %v950_v19  ;;  %1368 = vmatpush.msrb.mxu0 %v950_v19 }
 0x36f   : > { %1008 = vmatmul.f32.gmra.mxu2 %v633_v12 }
 0x370   : > { %1038 = vmatpush.msra.mxu3 %v948_v22  ;;  %1369 = vmatpush.msrb.mxu0 %v948_v22 }
 0x373   : > { %v946_v24 = vpop.xlane.xlu2 %945  ;;  %v944_v26 = vpop.xlane.xlu0 %943 }
 0x374   : > { %1039 = vmatpush.msra.mxu3 %v946_v24  ;;  %1370 = vmatpush.msrb.mxu0 %v946_v24  ;;  %v942_v28 = vpop.xlane.xlu1 %941 }
 0x376   : > { %1040 = vmatpush.msra.mxu3 %v944_v26  ;;  %1371 = vmatpush.msrb.mxu0 %v944_v26  ;;  %v634_v26 = vld [vmem:[#allocation7 + $0x50] sm:$0xff] }
 0x377   : > { %1011 = vmatmul.f32.gmra.mxu2 %v634_v26 }
 0x378   : > { %1041 = vmatpush.msra.mxu3 %v942_v28  ;;  %1372 = vmatpush.msrb.mxu0 %v942_v28 }
 0x37b   : > { %v940_v29 = vpop.xlane.xlu2 %939  ;;  %v938_v30 = vpop.xlane.xlu0 %937 }
 0x37c   : > { %1042 = vmatpush.msra.mxu3 %v940_v29  ;;  %1373 = vmatpush.msrb.mxu0 %v940_v29  ;;  %v936_v31 = vpop.xlane.xlu1 %935 }
 0x37e   : > { %1043 = vmatpush.msra.mxu3 %v938_v30  ;;  %1374 = vmatpush.msrb.mxu0 %v938_v30 }
 0x380   : > { %1044 = vmatpush.msra.mxu3 %v936_v31  ;;  %1375 = vmatpush.msrb.mxu0 %v936_v31 }
 0x383   : > { %v934_v33 = vpop.xlane.xlu2 %933 }
 0x384   : > { %1045 = vmatpush.msra.mxu3 %v934_v33  ;;  %1376 = vmatpush.msrb.mxu0 %v934_v33 }
 0x385   : > { %1046 = vmatmul.f32.vlgmr.msra.gmra.mxu3 %v2893_v32 }
 0x389   : > { %v2926_v44 = vpop.f32.mrf.mxu3 }
 0x38d   : > { %1049 = vmatmul.f32.gmra.mxu3 %v2896_v34 }
 0x391   : > { %v2931_v47 = vpop.f32.mrf.mxu3  ;;  %v2951_v7 = vpop.f32.mrf.mxu2 }
 0x392   : > { %3222 = vst [vmem:[#allocation21_spill] sm:$0xff] %v2951_v7 }
 0x395   : > { %1052 = vmatmul.f32.gmra.mxu3 %v2899_v35 }
 0x399   : > { %v2938_v52 = vpop.f32.mrf.mxu3  ;;  %v2953_v14 = vpop.f32.mrf.mxu2 }
 0x39a   : > { %3223 = vst [vmem:[#allocation22_spill] sm:$0xff] %v2953_v14 }
 0x39d   : > { %1055 = vmatmul.f32.gmra.mxu3 %v2902_v36 }
 0x3a1   : > { %v2943_v58 = vpop.f32.mrf.mxu3  ;;  %v2955_v20 = vpop.f32.mrf.mxu2 }
 0x3a2   : > { %3224 = vst [vmem:[#allocation23_spill] sm:$0xff] %v2955_v20 }
 0x3a5   : > { %1058 = vmatmul.f32.gmra.mxu3 %v2905_v37 }
 0x3a9   : > { %v2949_v59 = vpop.f32.mrf.mxu3  ;;  %v2957_v25 = vpop.f32.mrf.mxu2 }
 0x3aa   : > { %3225 = vst [vmem:[#allocation24_spill] sm:$0xff] %v2957_v25 }
 0x3ad   : > { %1061 = vmatmul.f32.gmra.mxu3 %v2908_v38 }
 0x3b1   : > { %v2959_v0 = vpop.f32.mrf.mxu2 }
 0x3b5   : > { %1064 = vmatmul.f32.gmra.mxu3 %v2911_v39 }
 0x3b9   : > { %v2961_v27 = vpop.f32.mrf.mxu2 }
 0x3bd   : > { %1067 = vmatmul.f32.gmra.mxu3 %v2914_v40 }
 0x3c1   : > { %v2963_v6 = vpop.f32.mrf.mxu2 }
 0x3c5   : > { %1070 = vmatmul.f32.gmra.mxu3 %v2917_v41 }
 0x3cd   : > { %1073 = vmatmul.f32.gmra.mxu3 %v2920_v42 }
 0x3d5   : > { %1076 = vmatmul.f32.gmra.mxu3 %v2923_v43 }
 0x3dd   : > { %1079 = vmatmul.f32.gmra.mxu3 %v2928_v45 }
 0x3e5   : > { %1082 = vmatmul.f32.gmra.mxu3 %v2933_v1 }
 0x3ed   : > { %1085 = vmatmul.f32.gmra.mxu3 %v2936_v9 }
 0x3f5   : > { %1088 = vmatmul.f32.gmra.mxu3 %v2941_v56 }
 0x3fd   : > { %1091 = vmatmul.f32.gmra.mxu3 %v2946_v61 }
 0x408   : > { %v1047_v55 = vpop.f32.mrf.mxu3 }
 0x410   : > { %v1050_v53 = vpop.f32.mrf.mxu3 }
 0x418   : > { %v1053_v2 = vpop.f32.mrf.mxu3 }
 0x420   : > { %v1056_v49 = vpop.f32.mrf.mxu3 }
 0x428   : > { %v1059_v10 = vpop.f32.mrf.mxu3 }
 0x430   : > { %v1062_v15 = vpop.f32.mrf.mxu3 }
 0x438   : > { %v1065_v17 = vpop.f32.mrf.mxu3 }
 0x440   : > { %v1068_v19 = vpop.f32.mrf.mxu3 }
 0x448   : > { %v1071_v22 = vpop.f32.mrf.mxu3 }
 0x450   : > { %v1074_v24 = vpop.f32.mrf.mxu3 }
 0x458   : > { %v1077_v28 = vpop.f32.mrf.mxu3 }
 0x460   : > { %v1080_v29 = vpop.f32.mrf.mxu3 }
 0x461   : > { %1152 = vperm.xlu1 %1999, %v1080_v29  }
 0x468   : > { %v1083_v30 = vpop.f32.mrf.mxu3 }
 0x469   : > { %1157 = vperm.xlu0 %1998, %v1083_v30  }
 0x470   : > { %v1086_v31 = vpop.f32.mrf.mxu3 }
 0x471   : > { %1162 = vperm.xlu2 %2000, %v1086_v31  }
 0x478   : > { %v1089_v33 = vpop.f32.mrf.mxu3 }
 0x479   : > { %1142 = vperm.xlu2 %2000, %v1074_v24   ;;  %1167 = vperm.xlu1 %1999, %v1089_v33  }
 0x480   : > { %v1092_v46 = vpop.f32.mrf.mxu3 }
 0x481   : > { %1127 = vperm.xlu2 %2000, %v1065_v17   ;;  %1137 = vperm.xlu1 %1999, %v1071_v22  }
 0x482   : > { %1172 = vperm.xlu0 %1998, %v1092_v46  }
 0x489   : > { %1112 = vperm.xlu2 %2000, %v1056_v49   ;;  %1122 = vperm.xlu1 %1999, %v1062_v15   ;;  %v2965_v49 = vpop.f32.mrf.mxu2 }
 0x48a   : > { %1147 = vperm.xlu0 %1998, %v1077_v28  }
 0x491   : > { %1097 = vperm.xlu2 %2000, %v1047_v55   ;;  %1107 = vperm.xlu1 %1999, %v1053_v2   ;;  %v2967_v2 = vpop.f32.mrf.mxu2 }
 0x492   : > { %1132 = vperm.xlu0 %1998, %v1068_v19  }
 0x499   : > { %v2969_v15 = vpop.f32.mrf.mxu2 }
 0x49a   : > { %1117 = vperm.xlu0 %1998, %v1059_v10  }
 0x4a1   : > { %v2975_v29 = vpop.f32.mrf.mxu2 }
 0x4a2   : > { %1102 = vperm.xlu0 %1998, %v1050_v53  }
 0x4cb   : > { %v1163_v8 = vpop.permute.xlu2 %1162 }
 0x4cc   : > { %v1188_v24 = vadd.f32 %v1163_v8, %v2938_v52 }
 0x4d3   : > { %v1153_v55 = vpop.permute.xlu1 %1152  ;;  %v1143_v53 = vpop.permute.xlu2 %1142 }
 0x4d4   : > { %v1186_v30 = vadd.f32 %v1153_v55, %v2926_v44  ;;  %v1184_v8 = vadd.f32 %v1143_v53, %v2969_v15 }
 0x4db   : > { %v1158_v10 = vpop.permute.xlu0 %1157 }
 0x4dc   : > { %v1187_v28 = vadd.f32 %v1158_v10, %v2931_v47 }
 0x4eb   : > { %v1168_v12 = vpop.permute.xlu1 %1167 }
 0x4ec   : > { %v1189_v19 = vadd.f32 %v1168_v12, %v2943_v58  ;;  %v1128_v12 = vpop.permute.xlu2 %1127 }
 0x4f3   : > { %v1138_v26 = vpop.permute.xlu1 %1137 }
 0x4f4   : > { %v1173_v17 = vpop.permute.xlu0 %1172  ;;  %v1183_v10 = vadd.f32 %v1138_v26, %v2967_v2 }
 0x4f5   : > { %v1190_v22 = vadd.f32 %v1173_v17, %v2949_v59 }
 0x4f7   : > { %2037 = vtanh.f32 %v1190_v22 }
 0x4f8   : > { %2039 = vtanh.f32 %v1189_v19 }
 0x4f9   : > { %2041 = vtanh.f32 %v1188_v24 }
 0x4fa   : > { %2043 = vtanh.f32 %v1187_v28 }
 0x4fb   : > { %2045 = vtanh.f32 %v1186_v30  ;;  %v1123_v19 = vpop.permute.xlu1 %1122 }
 0x4fc   : > { %v1148_v31 = vpop.permute.xlu0 %1147  ;;  %v1180_v53 = vadd.f32 %v1123_v19, %v2961_v27 }
 0x4fd   : > { %v2038_v33 = vpop.eup %2037  ;;  %v1185_v46 = vadd.f32 %v1148_v31, %v2975_v29  ;;  %v1181_v31 = vadd.f32 %v1128_v12, %v2963_v6 }
 0x4fe   : > { %1207 = vmatpush.msrb.mxu1 %v2038_v33  ;;  %v2040_v17 = vpop.eup %2039 }
 0x4ff   : > { %v2042_v22 = vpop.eup %2041  ;;  %2047 = vtanh.f32 %v1185_v46 }
 0x500   : > { %1208 = vmatpush.msrb.mxu1 %v2040_v17  ;;  %v2044_v24 = vpop.eup %2043  ;;  %2049 = vtanh.f32 %v1184_v8  ;;  %v1113_v17 = vpop.permute.xlu2 %1112 }
 0x501   : > { %v2046_v28 = vpop.eup %2045  ;;  %2051 = vtanh.f32 %v1183_v10  ;;  %v1178_v12 = vadd.f32 %v1113_v17, %v2957_v25  ;;  %v697_v25 = vld [vmem:[%s3191_s10 + $0x48] sm:$0xff] }
 0x502   : > { %1209 = vmatpush.msrb.mxu1 %v2042_v22 }
 0x503   : > { %v1108_v8 = vpop.permute.xlu1 %1107 }
 0x504   : > { %1210 = vmatpush.msrb.mxu1 %v2044_v24  ;;  %v1133_v55 = vpop.permute.xlu0 %1132  ;;  %v1177_v19 = vadd.f32 %v1108_v8, %v2955_v20 }
 0x505   : > { %v1182_v33 = vadd.f32 %v1133_v55, %v2965_v49  ;;  %v2048_v30 = vpop.eup %2047 }
 0x506   : > { %1211 = vmatpush.msrb.mxu1 %v2046_v28  ;;  %v2050_v26 = vpop.eup %2049 }
 0x507   : > { %2053 = vtanh.f32 %v1182_v33  ;;  %v2052_v46 = vpop.eup %2051 }
 0x508   : > { %1212 = vmatpush.msrb.mxu1 %v2048_v30  ;;  %2055 = vtanh.f32 %v1181_v31  ;;  %v1098_v31 = vpop.permute.xlu2 %1097 }
 0x509   : > { %2057 = vtanh.f32 %v1180_v53  ;;  %v1175_v53 = vadd.f32 %v1098_v31, %v2951_v7 }
 0x50a   : > { %1213 = vmatpush.msrb.mxu1 %v2050_v26 }
 0x50c   : > { %1214 = vmatpush.msrb.mxu1 %v2052_v46  ;;  %v1118_v22 = vpop.permute.xlu0 %1117 }
 0x50d   : > { %v2054_v24 = vpop.eup %2053  ;;  %v1179_v10 = vadd.f32 %v1118_v22, %v2959_v0 }
 0x50e   : > { %1215 = vmatpush.msrb.mxu1 %v2054_v24  ;;  %v2056_v55 = vpop.eup %2055  ;;  %v2994_v24 = vld [vmem:[%s556_s30] sm:$0x1]  ;;  %s1672_s30 = sshll.u32 %s1668_s17, 4  ;;  %s1673_s30 = int_to_ptr.hbm [resolvable:$true] %s1672_s30 }
 0x50f   : > { %2059 = vtanh.f32 %v1179_v10  ;;  %v2058_v28 = vpop.eup %2057  ;;  %3226 = vst [vmem:[#allocation25_spill] sm:$0xff] %v2994_v24  ;;  %s2308_s15 = sshra.s32 %s1673_s30, 4  ;;  %s2309_s15 = int_to_ptr.hbm [resolvable:$true] %s2308_s15 }
 0x510   : > { %1216 = vmatpush.msrb.mxu1 %v2056_v55  ;;  %2061 = vtanh.f32 %v1178_v12  ;;  %v1228_v12 = vsub.f32 1.0, %v2994_v24  ;;  %s2310_s8 = scalar_lea.hbm %s2309_s15, 1  ;;  %p2315_p9 = scmp.lt.s32.totalorder %s2309_s15, %s3192_s11 }
 0x511   : > { %2063 = vtanh.f32 %v1177_v19  ;;  %p2311_p1 = scmp.ne.s32.totalorder %s2309_s15, %s2310_s8  ;;  %p2316_p2 = scmp.lt.s32.totalorder %s2314_s26, %s2310_s8 }
 0x512   : > { %1217 = vmatpush.msrb.mxu1 %v2058_v28  ;;  %v2997_v10 = vmul.f32 -1e+30, %v1228_v12 }
 0x513   : > { %p2312_p4 = pnand %p2311_p1, %p2572_p5  ;;  %p2317_p10 = por %p2316_p2, %p2315_p9 }
 0x514   : > { %v1103_v33 = vpop.permute.xlu0 %1102  ;;  %3227 = vst [vmem:[#allocation26_spill] sm:$0xff] %v2997_v10 }
 0x515   : > { %v2060_v30 = vpop.eup %2059  ;;  %v1176_v17 = vadd.f32 %v1103_v33, %v2953_v14  ;;  %v698_v14 = vld [vmem:[%s3191_s10 + $0x50] sm:$0xff]  ;;  %p2313_p11 = pneg %p2312_p4 }
 0x516   : > { %1218 = vmatpush.msrb.mxu1 %v2060_v30  ;;  %v2062_v26 = vpop.eup %2061 }
 0x517   : > { %2065 = vtanh.f32 %v1176_v17  ;;  %v2064_v46 = vpop.eup %2063  ;;  %p2318_p12 = pnand %p2317_p10, %p2313_p11 }
 0x518   : > { %1219 = vmatpush.msrb.mxu1 %v2062_v26  ;;  %2067 = vtanh.f32 %v1175_v53 }
 0x51a   : > { %1220 = vmatpush.msrb.mxu1 %v2064_v46 }
 0x51d   : > { %v2066_v8 = vpop.eup %2065 }
 0x51e   : > { %1221 = vmatpush.msrb.mxu1 %v2066_v8  ;;  %v2068_v22 = vpop.eup %2067 }
 0x520   : > { %1222 = vmatpush.msrb.mxu1 %v2068_v22 }
 0x521   : > { %1223 = vmatmul.f32.vlgmr.msrb.gmra.mxu1 %v2770_v51 }
 0x59e   : > { %v1224_v55 = vpop.f32.mrf.mxu1 }
 0x59f   : > { %v1227_v19 = vmul.f32 %v1224_v55, %v2994_v24 }
 0x5a1   : > { %v1230_v28 = vadd.f32 %v2997_v10, %v1227_v19  ;;  %v699_v10 = vld [vmem:[%s3191_s10 + $0x58] sm:$0xff] }
 0x5a3   : > { %v1231_v31 = vsel %vm889_vm0, %v1230_v28, -inf }
 0x5a4   : > { %1232 = vmax.xlane.f32.xlu1 %v1231_v31 }
 0x617   : > { %v1233_v51 = vpop.xlane.xlu1 %1232 }
 0x618   : > { %v1234_v33 = vsub.f32 %v1230_v28, %v1233_v51 }
 0x61a   : > { %v1235_v30 = vmul.f32 1.442695, %v1234_v33 }
 0x61c   : > { %2069 = vpow2.f32 %v1235_v30 }
 0x622   : > { %v2070_v53 = vpop.eup %2069 }
 0x623   : > { %v1237_v17 = vsel %vm889_vm0, %v2070_v53, 0.0 }
 0x624   : > { %1238 = vadd.xlane.f32.xlu0 %v1237_v17 }
 0x697   : > { %v1239_v26 = vpop.xlane.xlu0 %1238 }
 0x698   : > { %2071 = vlog2.f32 %v1239_v26 }
 0x69e   : > { %v2072_v46 = vpop.eup %2071 }
 0x69f   : > { %v1241_v8 = vmul.f32 0.6931472, %v2072_v46 }
 0x6a1   : > { %v1242_v22 = vsub.f32 %v1234_v33, %v1241_v8 }
 0x6a3   : > { %v1243_v12 = vmul.f32 1.442695, %v1242_v22  ;;  %1639 = vst [vmem:[%s539_s27] sm:$0x1] %v1242_v22 }
 0x6a5   : > { %2073 = vpow2.f32 %v1243_v12 }
 0x6ab   : > { %v2074_v55 = vpop.eup %2073 }
 0x6ac   : > { %v1246_v19 = vperm.slane %v2074_v55, 0 }
 0x6ae   : > { %v1263_v28 = vmul.f32 %v1246_v19, %v2794_v3  ;;  %v1262_v31 = vmul.f32 %v1246_v19, %v2797_v48  ;;  %v1261_v51 = vmul.f32 %v1246_v19, %v2801_v4  ;;  %v1260_v30 = vmul.f32 %v1246_v19, %v2806_v5 }
 0x6af   : > { %v1259_v33 = vmul.f32 %v1246_v19, %v2815_v50  ;;  %v1258_v53 = vmul.f32 %v1246_v19, %v2822_v54  ;;  %v1257_v17 = vmul.f32 %v1246_v19, %v2826_v11  ;;  %v1256_v3 = vmul.f32 %v1246_v19, %v2831_v13 }
 0x6b0   : > { %1294 = vadd.xlane.f32.xlu2 %v1263_v28  ;;  %1292 = vadd.xlane.f32.xlu1 %v1262_v31  ;;  %v1255_v48 = vmul.f32 %v1246_v19, %v2840_v57  ;;  %v1254_v4 = vmul.f32 %v1246_v19, %v2847_v60  ;;  %v1253_v5 = vmul.f32 %v1246_v19, %v2851_v16  ;;  %v661_v28 = vld [vmem:[#allocation10 + $0x28] sm:$0xff] }
 0x6b1   : > { %1290 = vadd.xlane.f32.xlu0 %v1261_v51  ;;  %v1252_v50 = vmul.f32 %v1246_v19, %v2856_v18  ;;  %v1251_v54 = vmul.f32 %v1246_v19, %v2865_v62  ;;  %v1250_v11 = vmul.f32 %v1246_v19, %v2872_v63  ;;  %v1249_v13 = vmul.f32 %v1246_v19, %v2876_v21  ;;  %v657_v62 = vld [vmem:[#allocation10 + $0x8] sm:$0xff] }
 0x6b2   : > { %v1248_v57 = vmul.f32 %v1246_v19, %v2881_v23  ;;  %1377 = vmatmul.f32.vlgmr.msrb.gmra.mxu0 %v657_v62  ;;  %v659_v23 = vld [vmem:[#allocation10 + $0x18] sm:$0xff]  ;;  %v672_v62 = vld [vmem:[#allocation10 + $0x80] sm:$0xff] }
 0x6b8   : > { %1288 = vadd.xlane.f32.xlu2 %v1260_v30  ;;  %1286 = vadd.xlane.f32.xlu1 %v1259_v33  ;;  %v663_v30 = vld [vmem:[#allocation10 + $0x38] sm:$0xff] }
 0x6b9   : > { %1284 = vadd.xlane.f32.xlu0 %v1258_v53  ;;  %v656_v53 = vld [vmem:[#allocation10] sm:$0xff] }
 0x6ba   : > { %1380 = vmatmul.f32.gmra.mxu0 %v659_v23  ;;  %v676_v23 = vld [vmem:[#allocation10 + $0xa0] sm:$0xff] }
 0x6c0   : > { %1282 = vadd.xlane.f32.xlu2 %v1257_v17  ;;  %1280 = vadd.xlane.f32.xlu1 %v1256_v3  ;;  %v665_v3 = vld [vmem:[#allocation10 + $0x48] sm:$0xff] }
 0x6c1   : > { %1278 = vadd.xlane.f32.xlu0 %v1255_v48  ;;  %v658_v48 = vld [vmem:[#allocation10 + $0x10] sm:$0xff] }
 0x6c2   : > { %1383 = vmatmul.f32.gmra.mxu0 %v661_v28  ;;  %v680_v28 = vld [vmem:[#allocation10 + $0xc0] sm:$0xff] }
 0x6c8   : > { %1276 = vadd.xlane.f32.xlu2 %v1254_v4  ;;  %1274 = vadd.xlane.f32.xlu1 %v1253_v5  ;;  %v667_v4 = vld [vmem:[#allocation10 + $0x58] sm:$0xff]  ;;  %v660_v5 = vld [vmem:[#allocation10 + $0x20] sm:$0xff] }
 0x6c9   : > { %1272 = vadd.xlane.f32.xlu0 %v1252_v50  ;;  %v669_v50 = vld [vmem:[#allocation10 + $0x68] sm:$0xff] }
 0x6ca   : > { %1386 = vmatmul.f32.gmra.mxu0 %v663_v30 }
 0x6d0   : > { %1270 = vadd.xlane.f32.xlu2 %v1251_v54  ;;  %1268 = vadd.xlane.f32.xlu1 %v1250_v11  ;;  %v662_v54 = vld [vmem:[#allocation10 + $0x30] sm:$0xff]  ;;  %v671_v11 = vld [vmem:[#allocation10 + $0x78] sm:$0xff] }
 0x6d1   : > { %1266 = vadd.xlane.f32.xlu0 %v1249_v13  ;;  %v664_v13 = vld [vmem:[#allocation10 + $0x40] sm:$0xff] }
 0x6d2   : > { %1389 = vmatmul.f32.gmra.mxu0 %v665_v3  ;;  %v688_v3 = vld [vmem:[%s3191_s10] sm:$0xff] }
 0x6d8   : > { %1264 = vadd.xlane.f32.xlu2 %v1248_v57  ;;  %v673_v57 = vld [vmem:[#allocation10 + $0x88] sm:$0xff] }
 0x6da   : > { %1392 = vmatmul.f32.gmra.mxu0 %v667_v4 }
 0x6e2   : > { %1395 = vmatmul.f32.gmra.mxu0 %v669_v50 }
 0x6ea   : > { %1398 = vmatmul.f32.gmra.mxu0 %v671_v11 }
 0x6f2   : > { %1401 = vmatmul.f32.gmra.mxu0 %v673_v57 }
 0x723   : > { %v1295_v60 = vpop.xlane.xlu2 %1294  ;;  %v1293_v26 = vpop.xlane.xlu1 %1292 }
 0x724   : > { %v1291_v16 = vpop.xlane.xlu0 %1290  ;;  %1296 = vmatpush.msra.mxu1 %v1295_v60  ;;  %v666_v60 = vld [vmem:[#allocation10 + $0x50] sm:$0xff] }
 0x726   : > { %1297 = vmatpush.msra.mxu1 %v1293_v26  ;;  %v675_v26 = vld [vmem:[#allocation10 + $0x98] sm:$0xff] }
 0x727   : > { %1404 = vmatmul.f32.gmra.mxu0 %v675_v26  ;;  %v690_v26 = vld [vmem:[%s3191_s10 + $0x10] sm:$0xff] }
 0x728   : > { %1298 = vmatpush.msra.mxu1 %v1291_v16  ;;  %v668_v16 = vld [vmem:[#allocation10 + $0x60] sm:$0xff] }
 0x72b   : > { %v1289_v18 = vpop.xlane.xlu2 %1288  ;;  %v1287_v46 = vpop.xlane.xlu1 %1286 }
 0x72c   : > { %v1285_v8 = vpop.xlane.xlu0 %1284  ;;  %1299 = vmatpush.msra.mxu1 %v1289_v18  ;;  %v677_v18 = vld [vmem:[#allocation10 + $0xa8] sm:$0xff] }
 0x72e   : > { %1300 = vmatpush.msra.mxu1 %v1287_v46  ;;  %v670_v46 = vld [vmem:[#allocation10 + $0x70] sm:$0xff] }
 0x72f   : > { %1407 = vmatmul.f32.gmra.mxu0 %v677_v18 }
 0x730   : > { %1301 = vmatpush.msra.mxu1 %v1285_v8  ;;  %v679_v8 = vld [vmem:[#allocation10 + $0xb8] sm:$0xff] }
 0x733   : > { %v1283_v63 = vpop.xlane.xlu2 %1282  ;;  %v1281_v21 = vpop.xlane.xlu1 %1280 }
 0x734   : > { %v1279_v22 = vpop.xlane.xlu0 %1278  ;;  %1302 = vmatpush.msra.mxu1 %v1283_v63  ;;  %v681_v63 = vld [vmem:[#allocation10 + $0xc8] sm:$0xff] }
 0x736   : > { %1303 = vmatpush.msra.mxu1 %v1281_v21  ;;  %v674_v21 = vld [vmem:[#allocation10 + $0x90] sm:$0xff] }
 0x737   : > { %1410 = vmatmul.f32.gmra.mxu0 %v679_v8 }
 0x738   : > { %1304 = vmatpush.msra.mxu1 %v1279_v22  ;;  %v683_v22 = vld [vmem:[#allocation10 + $0xd8] sm:$0xff] }
 0x73b   : > { %v1277_v12 = vpop.xlane.xlu2 %1276  ;;  %v1275_v55 = vpop.xlane.xlu1 %1274 }
 0x73c   : > { %1305 = vmatpush.msra.mxu1 %v1277_v12  ;;  %v1273_v19 = vpop.xlane.xlu0 %1272  ;;  %v685_v12 = vld [vmem:[#allocation10 + $0xe8] sm:$0xff] }
 0x73e   : > { %1306 = vmatpush.msra.mxu1 %v1275_v55  ;;  %v678_v55 = vld [vmem:[#allocation10 + $0xb0] sm:$0xff] }
 0x73f   : > { %1413 = vmatmul.f32.gmra.mxu0 %v681_v63 }
 0x740   : > { %1307 = vmatpush.msra.mxu1 %v1273_v19  ;;  %v687_v19 = vld [vmem:[#allocation10 + $0xf8] sm:$0xff] }
 0x743   : > { %v1271_v31 = vpop.xlane.xlu2 %1270  ;;  %v1269_v51 = vpop.xlane.xlu1 %1268 }
 0x744   : > { %1308 = vmatpush.msra.mxu1 %v1271_v31  ;;  %v1267_v33 = vpop.xlane.xlu0 %1266  ;;  %v1378_v31 = vpop.f32.mrf.mxu0 }
 0x746   : > { %1309 = vmatpush.msra.mxu1 %v1269_v51  ;;  %v682_v51 = vld [vmem:[#allocation10 + $0xd0] sm:$0xff] }
 0x747   : > { %1416 = vmatmul.f32.gmra.mxu0 %v683_v22 }
 0x748   : > { %1310 = vmatpush.msra.mxu1 %v1267_v33  ;;  %v684_v33 = vld [vmem:[#allocation10 + $0xe0] sm:$0xff] }
 0x74b   : > { %v1265_v17 = vpop.xlane.xlu2 %1264 }
 0x74c   : > { %1311 = vmatpush.msra.mxu1 %v1265_v17  ;;  %v1381_v30 = vpop.f32.mrf.mxu0  ;;  %v686_v17 = vld [vmem:[#allocation10 + $0xf0] sm:$0xff] }
 0x74d   : > { %1312 = vmatmul.f32.vlgmr.msra.gmra.mxu1 %v656_v53 }
 0x74f   : > { %1419 = vmatmul.f32.gmra.mxu0 %v685_v12 }
 0x754   : > { %v1384_v53 = vpop.f32.mrf.mxu0 }
 0x755   : > { %1315 = vmatmul.f32.gmra.mxu1 %v658_v48 }
 0x757   : > { %1422 = vmatmul.f32.gmra.mxu0 %v687_v19 }
 0x75c   : > { %v1387_v4 = vpop.f32.mrf.mxu0 }
 0x75d   : > { %1318 = vmatmul.f32.gmra.mxu1 %v660_v5 }
 0x764   : > { %v1390_v57 = vpop.f32.mrf.mxu0 }
 0x765   : > { %1321 = vmatmul.f32.gmra.mxu1 %v662_v54  ;;  %v689_v54 = vld [vmem:[%s3191_s10 + $0x8] sm:$0xff] }
 0x76c   : > { %v1393_v8 = vpop.f32.mrf.mxu0 }
 0x76d   : > { %1324 = vmatmul.f32.gmra.mxu1 %v664_v13 }
 0x774   : > { %v1396_v12 = vpop.f32.mrf.mxu0 }
 0x775   : > { %1327 = vmatmul.f32.gmra.mxu1 %v666_v60 }
 0x77d   : > { %1330 = vmatmul.f32.gmra.mxu1 %v668_v16 }
 0x785   : > { %1333 = vmatmul.f32.gmra.mxu1 %v670_v46 }
 0x78d   : > { %1336 = vmatmul.f32.gmra.mxu1 %v672_v62  ;;  %v691_v62 = vld [vmem:[%s3191_s10 + $0x18] sm:$0xff] }
 0x795   : > { %1339 = vmatmul.f32.gmra.mxu1 %v674_v21 }
 0x79d   : > { %1342 = vmatmul.f32.gmra.mxu1 %v676_v23  ;;  %v692_v23 = vld [vmem:[%s3191_s10 + $0x20] sm:$0xff] }
 0x7a5   : > { %1345 = vmatmul.f32.gmra.mxu1 %v678_v55 }
 0x7ad   : > { %1348 = vmatmul.f32.gmra.mxu1 %v680_v28 }
 0x7b5   : > { %1351 = vmatmul.f32.gmra.mxu1 %v682_v51 }
 0x7bd   : > { %1354 = vmatmul.f32.gmra.mxu1 %v684_v33 }
 0x7c5   : > { %1357 = vmatmul.f32.gmra.mxu1 %v686_v17  ;;  %v694_v17 = vld [vmem:[%s3191_s10 + $0x30] sm:$0xff] }
 0x7ca   : > { %v1313_v48 = vpop.f32.mrf.mxu1 }
 0x7cb   : > { %v1314_v5 = vadd.f32 %v1313_v48, %v688_v3 }
 0x7cd   : > { %v3025_v50 = vadd.f32 %v1378_v31, %v1314_v5  ;;  %v693_v31 = vld [vmem:[%s3191_s10 + $0x28] sm:$0xff] }
 0x7d2   : > { %v1316_v11 = vpop.f32.mrf.mxu1 }
 0x7d3   : > { %v1317_v13 = vadd.f32 %v1316_v11, %v689_v54  ;;  %v695_v54 = vld [vmem:[%s3191_s10 + $0x38] sm:$0xff] }
 0x7d5   : > { %v3030_v60 = vadd.f32 %v1381_v30, %v1317_v13  ;;  %v1399_v30 = vpop.f32.mrf.mxu0 }
 0x7da   : > { %v1319_v16 = vpop.f32.mrf.mxu1 }
 0x7db   : > { %v1320_v18 = vadd.f32 %v1319_v16, %v690_v26  ;;  %v696_v16 = vld [vmem:[%s3191_s10 + $0x40] sm:$0xff] }
 0x7dd   : > { %v3035_v46 = vadd.f32 %v1384_v53, %v1320_v18 }
 0x7e2   : > { %v1322_v63 = vpop.f32.mrf.mxu1 }
 0x7e3   : > { %v1323_v21 = vadd.f32 %v1322_v63, %v691_v62 }
 0x7e5   : > { %v3040_v22 = vadd.f32 %v1387_v4, %v1323_v21  ;;  %v1402_v4 = vpop.f32.mrf.mxu0 }
 0x7ea   : > { %v1325_v55 = vpop.f32.mrf.mxu1 }
 0x7eb   : > { %v1326_v19 = vadd.f32 %v1325_v55, %v692_v23 }
 0x7ed   : > { %v3045_v28 = vadd.f32 %v1390_v57, %v1326_v19  ;;  %v1405_v26 = vpop.f32.mrf.mxu0 }
 0x7f2   : > { %v1328_v51 = vpop.f32.mrf.mxu1 }
 0x7f3   : > { %v1329_v33 = vadd.f32 %v1328_v51, %v693_v31 }
 0x7f5   : > { %v3050_v53 = vadd.f32 %v1393_v8, %v1329_v33  ;;  %v1408_v63 = vpop.f32.mrf.mxu0 }
 0x7fa   : > { %v1331_v3 = vpop.f32.mrf.mxu1 }
 0x7fb   : > { %v1332_v48 = vadd.f32 %v1331_v3, %v694_v17 }
 0x7fd   : > { %v3055_v5 = vadd.f32 %v1396_v12, %v1332_v48  ;;  %v1411_v12 = vpop.f32.mrf.mxu0  ;;  %v701_v48 = vld [vmem:[%s3191_s10 + $0x68] sm:$0xff] }
 0x802   : > { %v1334_v11 = vpop.f32.mrf.mxu1 }
 0x803   : > { %v1335_v13 = vadd.f32 %v1334_v11, %v695_v54  ;;  %v700_v11 = vld [vmem:[%s3191_s10 + $0x60] sm:$0xff] }
 0x805   : > { %v1400_v57 = vadd.f32 %v1399_v30, %v1335_v13  ;;  %v1414_v19 = vpop.f32.mrf.mxu0  ;;  %v702_v30 = vld [vmem:[%s3191_s10 + $0x70] sm:$0xff] }
 0x80a   : > { %v1337_v18 = vpop.f32.mrf.mxu1 }
 0x80b   : > { %v1338_v8 = vadd.f32 %v1337_v18, %v696_v16 }
 0x80d   : > { %v1403_v62 = vadd.f32 %v1402_v4, %v1338_v8  ;;  %v1417_v51 = vpop.f32.mrf.mxu0  ;;  %v703_v4 = vld [vmem:[%s3191_s10 + $0x78] sm:$0xff] }
 0x812   : > { %v1340_v21 = vpop.f32.mrf.mxu1 }
 0x815   : > { %v1420_v17 = vpop.f32.mrf.mxu0 }
 0x81a   : > { %v1343_v23 = vpop.f32.mrf.mxu1 }
 0x81d   : > { %v1423_v16 = vpop.f32.mrf.mxu0 }
 0x822   : > { %v1346_v55 = vpop.f32.mrf.mxu1 }
 0x82a   : > { %v1349_v31 = vpop.f32.mrf.mxu1 }
 0x82b   : > { %v1350_v24 = vadd.f32 %v1349_v31, %v700_v11 }
 0x832   : > { %v1352_v33 = vpop.f32.mrf.mxu1 }
 0x833   : > { %v1353_v18 = vadd.f32 %v1352_v33, %v701_v48  ;;  %v1344_v33 = vadd.f32 %v1343_v23, %v698_v14  ;;  %v1415_v48 = vadd.f32 %v1414_v19, %v1350_v24 }
 0x83a   : > { %v1355_v3 = vpop.f32.mrf.mxu1 }
 0x83b   : > { %v1356_v54 = vadd.f32 %v1355_v3, %v702_v30  ;;  %v1347_v3 = vadd.f32 %v1346_v55, %v699_v10  ;;  %v1418_v30 = vadd.f32 %v1417_v51, %v1353_v18 }
 0x83d   : > { %v1421_v7 = vadd.f32 %v1420_v17, %v1356_v54  ;;  %v1409_v17 = vadd.f32 %v1408_v63, %v1344_v33 }
 0x842   : > { %v1358_v13 = vpop.f32.mrf.mxu1 }
 0x843   : > { %v1359_v8 = vadd.f32 %v1358_v13, %v703_v4  ;;  %v1341_v4 = vadd.f32 %v1340_v21, %v697_v25  ;;  %v1412_v13 = vadd.f32 %v1411_v12, %v1347_v3 }
 0x845   : > { %v1424_v20 = vadd.f32 %v1423_v16, %v1359_v8  ;;  %v1406_v11 = vadd.f32 %v1405_v26, %v1341_v4 }
 0x847   : > { %2075 = vtanh.f32 %v1424_v20 }
 0x848   : > { %2077 = vtanh.f32 %v1421_v7 }
 0x849   : > { %2079 = vtanh.f32 %v1418_v30 }
 0x84a   : > { %2081 = vtanh.f32 %v1415_v48 }
 0x84b   : > { %2083 = vtanh.f32 %v1412_v13 }
 0x84c   : > { %2085 = vtanh.f32 %v1409_v17 }
 0x84d   : > { %v2076_v31 = vpop.eup %2075  ;;  %2087 = vtanh.f32 %v1406_v11 }
 0x84e   : > { %1442 = vmatpush.msrb.mxu2 %v2076_v31  ;;  %v2078_v54 = vpop.eup %2077  ;;  %2089 = vtanh.f32 %v1403_v62 }
 0x84f   : > { %v2080_v10 = vpop.eup %2079  ;;  %2091 = vtanh.f32 %v1400_v57 }
 0x850   : > { %1443 = vmatpush.msrb.mxu2 %v2078_v54  ;;  %v2082_v20 = vpop.eup %2081  ;;  %2093 = vtanh.f32 %v3055_v5 }
 0x851   : > { %v2084_v14 = vpop.eup %2083  ;;  %2095 = vtanh.f32 %v3050_v53 }
 0x852   : > { %1444 = vmatpush.msrb.mxu2 %v2080_v10  ;;  %v2086_v7 = vpop.eup %2085  ;;  %2097 = vtanh.f32 %v3045_v28 }
 0x853   : > { %v2088_v25 = vpop.eup %2087  ;;  %2099 = vtanh.f32 %v3040_v22 }
 0x854   : > { %1445 = vmatpush.msrb.mxu2 %v2082_v20  ;;  %v2090_v24 = vpop.eup %2089  ;;  %2101 = vtanh.f32 %v3035_v46 }
 0x855   : > { %v2092_v26 = vpop.eup %2091  ;;  %2103 = vtanh.f32 %v3030_v60 }
 0x856   : > { %1446 = vmatpush.msrb.mxu2 %v2084_v14  ;;  %v2094_v63 = vpop.eup %2093  ;;  %2105 = vtanh.f32 %v3025_v50 }
 0x857   : > { %v2096_v62 = vpop.eup %2095 }
 0x858   : > { %1447 = vmatpush.msrb.mxu2 %v2086_v7  ;;  %v2098_v57 = vpop.eup %2097  ;;  %v3228_v7 = vld [vmem:[#allocation24_spill] sm:$0xff] }
 0x859   : > { %v2100_v5 = vpop.eup %2099 }
 0x85a   : > { %1448 = vmatpush.msrb.mxu2 %v2088_v25  ;;  %v2102_v53 = vpop.eup %2101 }
 0x85b   : > { %v2104_v28 = vpop.eup %2103 }
 0x85c   : > { %1449 = vmatpush.msrb.mxu2 %v2090_v24  ;;  %v2106_v21 = vpop.eup %2105 }
 0x85e   : > { %1450 = vmatpush.msrb.mxu2 %v2092_v26 }
 0x860   : > { %1451 = vmatpush.msrb.mxu2 %v2094_v63 }
 0x862   : > { %1452 = vmatpush.msrb.mxu2 %v2096_v62 }
 0x864   : > { %1453 = vmatpush.msrb.mxu2 %v2098_v57  ;;  %v3229_v57 = vld [vmem:[#allocation22_spill] sm:$0xff] }
 0x866   : > { %1454 = vmatpush.msrb.mxu2 %v2100_v5 }
 0x868   : > { %1455 = vmatpush.msrb.mxu2 %v2102_v53  ;;  %v3230_v53 = vld [vmem:[#allocation23_spill] sm:$0xff] }
 0x86a   : > { %1456 = vmatpush.msrb.mxu2 %v2104_v28  ;;  %v3231_v28 = vld [vmem:[#allocation21_spill] sm:$0xff] }
 0x86c   : > { %1457 = vmatpush.msrb.mxu2 %v2106_v21 }
 0x86d   : > { %1458 = vmatmul.f32.vlgmr.msrb.gmra.mxu2 %v2893_v32 }
 0x875   : > { %1461 = vmatmul.f32.gmra.mxu2 %v2896_v34 }
 0x87d   : > { %1464 = vmatmul.f32.gmra.mxu2 %v2899_v35 }
 0x885   : > { %1467 = vmatmul.f32.gmra.mxu2 %v2902_v36 }
 0x88d   : > { %1470 = vmatmul.f32.gmra.mxu2 %v2905_v37 }
 0x895   : > { %1473 = vmatmul.f32.gmra.mxu2 %v2908_v38 }
 0x89d   : > { %1476 = vmatmul.f32.gmra.mxu2 %v2911_v39 }
 0x8a5   : > { %1479 = vmatmul.f32.gmra.mxu2 %v2914_v40 }
 0x8ad   : > { %1482 = vmatmul.f32.gmra.mxu2 %v2917_v41 }
 0x8b5   : > { %1485 = vmatmul.f32.gmra.mxu2 %v2920_v42 }
 0x8bd   : > { %1488 = vmatmul.f32.gmra.mxu2 %v2923_v43 }
 0x8c5   : > { %1491 = vmatmul.f32.gmra.mxu2 %v2928_v45 }
 0x8cd   : > { %1494 = vmatmul.f32.gmra.mxu2 %v2933_v1 }
 0x8d5   : > { %1497 = vmatmul.f32.gmra.mxu2 %v2936_v9 }
 0x8dd   : > { %1500 = vmatmul.f32.gmra.mxu2 %v2941_v56 }
 0x8e5   : > { %1503 = vmatmul.f32.gmra.mxu2 %v2946_v61 }
 0x8f0   : > { %v1459_v32 = vpop.f32.mrf.mxu2 }
 0x8f8   : > { %v1462_v34 = vpop.f32.mrf.mxu2 }
 0x900   : > { %v1465_v35 = vpop.f32.mrf.mxu2 }
 0x908   : > { %v1468_v36 = vpop.f32.mrf.mxu2 }
 0x910   : > { %v1471_v37 = vpop.f32.mrf.mxu2 }
 0x918   : > { %v1474_v38 = vpop.f32.mrf.mxu2 }
 0x920   : > { %v1477_v39 = vpop.f32.mrf.mxu2 }
 0x928   : > { %v1480_v40 = vpop.f32.mrf.mxu2 }
 0x930   : > { %v1483_v41 = vpop.f32.mrf.mxu2 }
 0x938   : > { %v1486_v42 = vpop.f32.mrf.mxu2 }
 0x940   : > { %v1489_v43 = vpop.f32.mrf.mxu2 }
 0x948   : > { %v1492_v45 = vpop.f32.mrf.mxu2 }
 0x950   : > { %v1495_v50 = vpop.f32.mrf.mxu2 }
 0x951   : > { %1569 = vperm.xlu0 %1998, %v1495_v50  }
 0x958   : > { %v1498_v1 = vpop.f32.mrf.mxu2 }
 0x959   : > { %1574 = vperm.xlu2 %2000, %v1498_v1  }
 0x960   : > { %v1501_v9 = vpop.f32.mrf.mxu2 }
 0x961   : > { %1559 = vperm.xlu2 %2000, %v1489_v43   ;;  %1579 = vperm.xlu0 %1998, %v1501_v9  }
 0x968   : > { %v1504_v56 = vpop.f32.mrf.mxu2 }
 0x969   : > { %1544 = vperm.xlu2 %2000, %v1480_v40   ;;  %1554 = vperm.xlu0 %1998, %v1486_v42  }
 0x96a   : > { %1584 = vperm.xlu1 %1999, %v1504_v56  }
 0x971   : > { %1529 = vperm.xlu2 %2000, %v1471_v37   ;;  %1539 = vperm.xlu0 %1998, %v1477_v39   ;;  %v2143_v37 = vld [vmem:[%s3187_s6] sm:$0x1]  ;;  %v3232_v39 = vld [vmem:[#allocation25_spill] sm:$0xff] }
 0x972   : > { %1564 = vperm.xlu1 %1999, %v1492_v45  }
 0x979   : > { %1514 = vperm.xlu2 %2000, %v1462_v34   ;;  %1524 = vperm.xlu0 %1998, %v1468_v36  }
 0x97a   : > { %1549 = vperm.xlu1 %1999, %v1483_v41   ;;  %v3233_v41 = vld [vmem:[#allocation26_spill] sm:$0xff] }
 0x981   : > { %1509 = vperm.xlu0 %1998, %v1459_v32  }
 0x982   : > { %1534 = vperm.xlu1 %1999, %v1474_v38  }
 0x98a   : > { %1519 = vperm.xlu1 %1999, %v1465_v35  }
 0x9b3   : > { %v1575_v60 = vpop.permute.xlu2 %1574 }
 0x9b4   : > { %v1600_v51 = vadd.f32 %v1575_v60, %v2938_v52 }
 0x9bb   : > { %v1560_v22 = vpop.permute.xlu2 %1559 }
 0x9bc   : > { %v1597_v3 = vadd.f32 %v1560_v22, %v2975_v29 }
 0x9c3   : > { %v1570_v61 = vpop.permute.xlu0 %1569  ;;  %v1545_v33 = vpop.permute.xlu2 %1544 }
 0x9c4   : > { %v1599_v16 = vadd.f32 %v1570_v61, %v2931_v47  ;;  %v1594_v29 = vadd.f32 %v1545_v33, %v2965_v49 }
 0x9d3   : > { %v1580_v46 = vpop.permute.xlu0 %1579 }
 0x9d4   : > { %v1601_v12 = vadd.f32 %v1580_v46, %v2943_v58 }
 0x9db   : > { %v1555_v19 = vpop.permute.xlu0 %1554 }
 0x9dc   : > { %v1585_v23 = vpop.permute.xlu1 %1584 }
 0x9dd   : > { %v1602_v55 = vadd.f32 %v1585_v23, %v2949_v59  ;;  %v1596_v59 = vadd.f32 %v1555_v19, %v2969_v15  ;;  %v1530_v15 = vpop.permute.xlu2 %1529 }
 0x9de   : > { %v1591_v14 = vadd.f32 %v1530_v15, %v2959_v0 }
 0x9df   : > { %2107 = vtanh.f32 %v1602_v55 }
 0x9e0   : > { %2109 = vtanh.f32 %v1601_v12 }
 0x9e1   : > { %2111 = vtanh.f32 %v1600_v51 }
 0x9e2   : > { %2113 = vtanh.f32 %v1599_v16 }
 0x9e3   : > { %v1540_v48 = vpop.permute.xlu0 %1539 }
 0x9e4   : > { %v1565_v18 = vpop.permute.xlu1 %1564  ;;  %v1593_v17 = vadd.f32 %v1540_v48, %v2963_v6 }
 0x9e5   : > { %v2108_v8 = vpop.eup %2107  ;;  %v1598_v30 = vadd.f32 %v1565_v18, %v2926_v44  ;;  %v1515_v24 = vpop.permute.xlu2 %1514 }
 0x9e6   : > { %1619 = vmatpush.msrb.mxu3 %v2108_v8  ;;  %v2110_v58 = vpop.eup %2109  ;;  %v1588_v5 = vadd.f32 %v1515_v24, %v3229_v57 }
 0x9e7   : > { %2115 = vtanh.f32 %v1598_v30  ;;  %v2112_v52 = vpop.eup %2111 }
 0x9e8   : > { %1620 = vmatpush.msrb.mxu3 %v2110_v58  ;;  %2117 = vtanh.f32 %v1597_v3  ;;  %v2114_v47 = vpop.eup %2113 }
 0x9e9   : > { %2119 = vtanh.f32 %v1596_v59 }
 0x9ea   : > { %1621 = vmatpush.msrb.mxu3 %v2112_v52 }
 0x9eb   : > { %v1525_v11 = vpop.permute.xlu0 %1524 }
 0x9ec   : > { %1622 = vmatpush.msrb.mxu3 %v2114_v47  ;;  %v1550_v4 = vpop.permute.xlu1 %1549  ;;  %v1590_v25 = vadd.f32 %v1525_v11, %v3228_v7 }
 0x9ed   : > { %v2116_v13 = vpop.eup %2115  ;;  %v1595_v44 = vadd.f32 %v1550_v4, %v2967_v2 }
 0x9ee   : > { %1623 = vmatpush.msrb.mxu3 %v2116_v13  ;;  %v2118_v31 = vpop.eup %2117 }
 0x9ef   : > { %2121 = vtanh.f32 %v1595_v44  ;;  %v2120_v54 = vpop.eup %2119 }
 0x9f0   : > { %1624 = vmatpush.msrb.mxu3 %v2118_v31  ;;  %2123 = vtanh.f32 %v1594_v29 }
 0x9f1   : > { %2125 = vtanh.f32 %v1593_v17 }
 0x9f2   : > { %1625 = vmatpush.msrb.mxu3 %v2120_v54 }
 0x9f3   : > { %v1510_v26 = vpop.permute.xlu0 %1509 }
 0x9f4   : > { %v1535_v10 = vpop.permute.xlu1 %1534  ;;  %v1587_v21 = vadd.f32 %v1510_v26, %v3231_v28 }
 0x9f5   : > { %v2122_v20 = vpop.eup %2121  ;;  %v1592_v49 = vadd.f32 %v1535_v10, %v2961_v27 }
 0x9f6   : > { %1626 = vmatpush.msrb.mxu3 %v2122_v20  ;;  %v2124_v2 = vpop.eup %2123 }
 0x9f7   : > { %2127 = vtanh.f32 %v1592_v49  ;;  %v2126_v6 = vpop.eup %2125 }
 0x9f8   : > { %1627 = vmatpush.msrb.mxu3 %v2124_v2  ;;  %2129 = vtanh.f32 %v1591_v14 }
 0x9f9   : > { %2131 = vtanh.f32 %v1590_v25 }
 0x9fa   : > { %1628 = vmatpush.msrb.mxu3 %v2126_v6 }
 0x9fc   : > { %v1520_v63 = vpop.permute.xlu1 %1519 }
 0x9fd   : > { %v2128_v62 = vpop.eup %2127  ;;  %v1589_v0 = vadd.f32 %v1520_v63, %v3230_v53 }
 0x9fe   : > { %1629 = vmatpush.msrb.mxu3 %v2128_v62  ;;  %v2130_v27 = vpop.eup %2129 }
 0x9ff   : > { %2133 = vtanh.f32 %v1589_v0  ;;  %v2132_v32 = vpop.eup %2131 }
 0xa00   : > { %1630 = vmatpush.msrb.mxu3 %v2130_v27  ;;  %2135 = vtanh.f32 %v1588_v5 }
 0xa01   : > { %2137 = vtanh.f32 %v1587_v21 }
 0xa02   : > { %1631 = vmatpush.msrb.mxu3 %v2132_v32 }
 0xa05   : > { %v2134_v34 = vpop.eup %2133 }
 0xa06   : > { %1632 = vmatpush.msrb.mxu3 %v2134_v34  ;;  %v2136_v35 = vpop.eup %2135 }
 0xa07   : > { %v2138_v36 = vpop.eup %2137 }
 0xa08   : > { %1633 = vmatpush.msrb.mxu3 %v2136_v35 }
 0xa0a   : > { %1634 = vmatpush.msrb.mxu3 %v2138_v36 }
 0xa0b   : > { %1635 = vmatmul.f32.vlgmr.msrb.gmra.mxu3 %v2143_v37 }
 0xa8e   : > { %v1636_v38 = vpop.f32.mrf.mxu3 }
 0xa8f   : > { %v1640_v40 = vmul.f32 %v1636_v38, %v3232_v39 }
 0xa91   : > { %v1641_v42 = vadd.f32 %v1640_v40, %v3233_v41 }
 0xa93   : > { %v1642_v43 = vsel %vm889_vm0, %v1641_v42, -inf }
 0xa94   : > { %1643 = vmax.xlane.f32.xlu1 %v1642_v43 }
 0xb07   : > { %v1644_v45 = vpop.xlane.xlu1 %1643 }
 0xb08   : > { %v1645_v50 = vsub.f32 %v1641_v42, %v1644_v45 }
 0xb0a   : > { %v1646_v1 = vmul.f32 1.442695, %v1645_v50 }
 0xb0c   : > { %2139 = vpow2.f32 %v1646_v1 }
 0xb12   : > { %v2140_v9 = vpop.eup %2139 }
 0xb13   : > { %v1648_v56 = vsel %vm889_vm0, %v2140_v9, 0.0 }
 0xb14   : > { %1649 = vadd.xlane.f32.xlu2 %v1648_v56 }
 0xb15   : > { %2321 = shalt.err (!%p2318_p12)
}
 0xb16   : > { %1919 = dma.vmem_to_hbm [thread:$0]  (%p2572_p5), %s1671_s19, 16, %s1673_s30, %s1656_s4  }
 0xb17   : > { %s1681_s20 = scalar_lea.hbm %s3193_s12, %s2497_s25  ;;  %s545_s17 = scalar_lea.vmem [#allocation12], %s2602_s13 }
 0xb18   : > { %s1683_s15 = sshll.u32 %s545_s17, 4  ;;  %s1685_s8 = sshll.u32 %s1681_s20, 4  ;;  %s1684_s15 = int_to_ptr.vmem [resolvable:$true] %s1683_s15  ;;  %s1686_s8 = int_to_ptr.hbm [resolvable:$true] %s1685_s8 }
 0xb19   : > { %s1660_s9 = scalar_lea.sflag [#allocation13], %s2602_s13  ;;  %s2336_s14 = sshra.s32 %s1686_s8, 4  ;;  %s2337_s14 = int_to_ptr.hbm [resolvable:$true] %s2336_s14 }
 0xb1a   : > { %s2338_s19 = scalar_lea.hbm %s2337_s14, 1  ;;  %s2342_s25 = scalar_lea.hbm %s3193_s12, 2 }
 0xb1b   : > { %p2339_p13 = scmp.ne.s32.totalorder %s2337_s14, %s2338_s19  ;;  %p2343_p7 = scmp.lt.s32.totalorder %s2337_s14, %s3193_s12 }
 0xb1c   : > { %p2344_p8 = scmp.lt.s32.totalorder %s2342_s25, %s2338_s19 }
 0xb1d   : > { %p2340_p0 = pnand %p2339_p13, %p2572_p5 }
 0xb1e   : > { %p2345_p1 = por %p2344_p8, %p2343_p7 }
 0xb1f   : > { %p2341_p3 = pneg %p2340_p0 }
 0xb21   : > { %p2346_p4 = pnand %p2345_p1, %p2341_p3 }
 0xb87   : > { %v1650_v61 = vpop.xlane.xlu2 %1649 }
 0xb88   : > { %2141 = vlog2.f32 %v1650_v61 }
 0xb8e   : > { %v2142_v60 = vpop.eup %2141 }
 0xb8f   : > { %v1652_v46 = vmul.f32 0.6931472, %v2142_v60 }
 0xb91   : > { %v1653_v22 = vsub.f32 %v1645_v50, %v1652_v46 }
 0xb93   : > { %1654 = vst [vmem:[%s545_s17] sm:$0x1] %v1653_v22 }
 0xb94   : > { %2349 = shalt.err (!%p2346_p4)
}
 0xb95   : > { %1920 = dma.vmem_to_hbm [thread:$0]  (%p2572_p5), %s1684_s15, 16, %s1686_s8, %s1660_s9  }
 0xb96 PF: > { %s3234_s13 = sld [smem:[#allocation19_spill]]  ;;  %p3236_p11 = scmp.ge.s32.totalorder %s2400_s24, 2 }
 0xb98   : > { %p1941_p9 = pnand %p3236_p11, %p2511_p6 }
 0xb9a   : > { %p1942_p2 = pneg %p1941_p9 }
 0xb9c   : > { %s1697_s16 = sand.u32 1, %s3234_s13  }
 0xb9d   : > { %s1698_s28 = scalar_lea.sflag [#allocation4], %s1697_s16 }
 0xb9e   : > { %2379 = dma.done.wait (%p1942_p2), %s1698_s28, 16  }
 0xb9f   : > { %2381 = vsyncadd (%p1942_p2), %s1698_s28, 4294967280  ;;  %s1707_s20 = scalar_lea.sflag [#allocation13], %s1697_s16 }
 0xba0   : > { %2383 = dma.done.wait (%p1942_p2), %s1707_s20, 16  }
 0xba1   : > { %2385 = vsyncadd (%p1942_p2), %s1707_s20, 4294967280  ;;  %p31_p5 = scmp.ge.s32.totalorder %s2559_s18, 4   ;;  %s3237_s21 = smov %s2392_s22 }
 0xba2   : > { %s3238_s22 = smov %s2396_s23  ;;  %s3239_s23 = smov %s2568_s7 }
 0xba3   : > { %s3240_s24 = smov %s2559_s18  ;;  %33 = sbr.rel (!%p31_p5) target bundleno = 14 (0xe), region = 151 }
 0xba8   :  { %1712 = vsyncpa [#allocation3], 1 }
 0xba9   :  { %1714 = vsyncpa [#allocation3 + $0x1], 1 }
 0xbaa   :  { %1715 = vsyncpa [#allocation6], 1 }
 0xbab   :  { %1716 = vsyncpa [#allocation9], 1 }
 0xbac   :  { %1717 = vsyncpa [#allocation4], 1 }
 0xbad   :  { %1719 = vsyncpa [#allocation4 + $0x1], 1 }
 0xbae   :  { %1720 = vsyncpa [#allocation13], 1 }
 0xbaf   :  { %1722 = vsyncpa [#allocation13 + $0x1], 1 }

</bundles_post_ra>
